<compile_context>
chip_gen: v6e
topology: v6e:2x2x1
jax: 0.10.0
libtpu: 0.0.40
codegen_flags: <defaults>
</compile_context>

<pallas_src>
import jax
import jax.numpy as jnp
import numpy as np
from jax.experimental import pallas as pl
from jax.experimental.pallas import tpu as pltpu

C_MID1 = 128   # channels after 1x1 conv
C_MID2 = 768   # channels after 2x2 conv
BN_EPS = 1e-5


def aux_head_kernel(x_ref, wf_ref, b1_ref, w2_ref, b2_ref, wc_ref, bc_ref, out_ref):
    """One batch tile of the whole aux head.

    x_ref  : (TILE_N, 49*C)   relu applied here; lane-dense flattened NHWC input
    wf_ref : (49*C, 512)      AvgPool(5,s=2) + 1x1 conv + BN scale, folded
    b1_ref : (1, 512)         BN(128) bias, tiled over the 4 pooled positions
    w2_ref : (512, 768)       2x2 conv flattened (p, cin) x cout, BN scale folded
    b2_ref : (1, 768)         BN(768) bias
    wc_ref : (768, NCLS_PAD)  classifier weight (padded to multiple of 128)
    bc_ref : (1, NCLS_PAD)    classifier bias (padded)
    out    : (TILE_N, NCLS_PAD)
    """
    x = jnp.maximum(x_ref[...], 0)                                          # ReLU
    # AvgPool + 1x1 conv + BN scale: one MXU matmul
    h = jnp.dot(x, wf_ref[...], preferred_element_type=jnp.float32)        # (TILE_N, 512)
    h = jnp.maximum(h + b1_ref[...], 0.0)                                   # BN bias + ReLU
    # 2x2 conv + BN scale
    z = jnp.dot(h.astype(w2_ref.dtype), w2_ref[...],
                preferred_element_type=jnp.float32)                         # (TILE_N, 768)
    z = jnp.maximum(z + b2_ref[...], 0.0)                                   # BN bias + ReLU
    # classifier
    logits = jnp.dot(z.astype(wc_ref.dtype), wc_ref[...],
                     preferred_element_type=jnp.float32) + bc_ref[...]
    out_ref[...] = logits.astype(out_ref.dtype)


def fold_bn(gamma, beta, mean, var, eps=BN_EPS):
    scale = gamma / jnp.sqrt(var + eps)
    bias = beta - mean * scale
    return scale, bias


def aux_head_forward(x_nchw, params, *, compute_dtype=jnp.float32):
    """Glue: layout change, pool/BN folding, padding; compute lives in the kernel."""
    N, C, H, W = x_nchw.shape
    assert (H, W) == (7, 7), "aux head expects 7x7 input (see NOTE)"
    K = H * W * C

    # NCHW -> NHWC -> (N, H*W*C): lane-dense activation layout (C alone is too narrow).
    x_flat = jnp.transpose(x_nchw, (0, 2, 3, 1)).reshape(N, K).astype(compute_dtype)

    # Batch tiling: MXU-friendly row tiles, padded with zero rows (sliced off after).
    if N >= 128:
        tile_n = 128
    else:
        tile_n = max(8, ((N + 7) // 8) * 8)
    n_pad = ((N + tile_n - 1) // tile_n) * tile_n
    if n_pad != N:
        x_flat = jnp.pad(x_flat, ((0, n_pad - N), (0, 0)))

    # ---------------- weight preparation (one-time, not per-call activation work) ----
    s1, b1 = fold_bn(params["g1"], params["be1"], params["rm1"], params["rv1"])
    s2, b2 = fold_bn(params["g2"], params["be2"], params["rm2"], params["rv2"])

    # 1x1 conv weight (C, 128) with BN(128) scale folded per output channel.
    w1s = params["w1"].reshape(C_MID1, C).T * s1[None, :]

    # AvgPool(5, stride=2, padding=0): 7x7 -> 2x2, folded with the 1x1 conv into a
    # (49*C, 4*128) block weight.  count_include_pad is irrelevant (padding=0).
    pool = np.zeros((4, H * W), dtype=np.float32)
    for oh in range(2):
        for ow in range(2):
            p = oh * 2 + ow
            for hh in range(oh * 2, oh * 2 + 5):
                for ww in range(ow * 2, ow * 2 + 5):
                    pool[p, hh * W + ww] = 1.0 / 25.0
    # wf[(h*7+w)*C + c, p*128 + o] = pool[p, h*7+w] * w1s[c, o]
    wf = jnp.einsum("pq,co->qcpo", jnp.asarray(pool), w1s).reshape(K, 4 * C_MID1)
    b1t = jnp.tile(b1, 4).reshape(1, 4 * C_MID1)           # BN bias per pooled position

    # 2x2 conv: (768, 128, 2, 2) -> (kh, kw, cin, cout) -> (512, 768), BN scale folded.
    w2f = jnp.transpose(params["w2"], (2, 3, 1, 0)).reshape(4 * C_MID1, C_MID2) * s2[None, :]
    b2r = b2.reshape(1, C_MID2)

    # Classifier padded to a lane-dense class dim (unmasked stores, full MXU column).
    ncls = params["wc"].shape[0]
    ncls_pad = ((ncls + 127) // 128) * 128
    wc = jnp.zeros((C_MID2, ncls_pad), jnp.float32).at[:, :ncls].set(params["wc"].T)
    bc = jnp.zeros((1, ncls_pad), jnp.float32).at[:, :ncls].set(params["bc"][None, :])

    # Cast matmul operands to compute dtype (bf16 on v5e/v6e/v7x halves DMA bytes and
    # uses the fast MXU path); accumulation stays f32, biases stay f32.
    wf = wf.astype(compute_dtype)
    w2f = w2f.astype(compute_dtype)
    wc = wc.astype(compute_dtype)

    flops = 2 * n_pad * (K * 4 * C_MID1 + 4 * C_MID1 * C_MID2 + C_MID2 * ncls_pad)
    bytes_accessed = (x_flat.size * x_flat.dtype.itemsize
                      + sum(int(a.size) * a.dtype.itemsize
                            for a in (wf, b1t, w2f, b2r, wc, bc))
                      + n_pad * ncls_pad * 4)

    full_spec = lambda a: pl.BlockSpec(a.shape, lambda i, _nd=a.ndim: (0,) * _nd)

    out = pl.pallas_call(
        aux_head_kernel,
        out_shape=jax.ShapeDtypeStruct((n_pad, ncls_pad), jnp.float32),
        grid=(n_pad // tile_n,),
        in_specs=[
            pl.BlockSpec((tile_n, K), lambda i: (i, 0)),    # x: tiled over batch
            full_spec(wf), full_spec(b1t),
            full_spec(w2f), full_spec(b2r),
            full_spec(wc), full_spec(bc),
        ],
        out_specs=pl.BlockSpec((tile_n, ncls_pad), lambda i: (i, 0)),
        compiler_params=pltpu.CompilerParams(dimension_semantics=("parallel",)),
        cost_estimate=pl.CostEstimate(flops=flops, transcendentals=0,
                                      bytes_accessed=bytes_accessed),
    )(x_flat, wf, b1t, w2f, b2r, wc, bc)

    return out[:N, :ncls]


def ref_forward(x_nchw, params):
    """Pure-JAX reference in PyTorch's NCHW convention (independent formulation)."""
    x = jnp.maximum(x_nchw.astype(jnp.float32), 0.0)
    pooled = jnp.stack(
        [jnp.stack(
            [jnp.mean(x[:, :, oh * 2:oh * 2 + 5, ow * 2:ow * 2 + 5], axis=(2, 3))
             for ow in range(2)], axis=-1)
         for oh in range(2)], axis=-2)                                  # (N, C, 2, 2)
    s1, b1 = fold_bn(params["g1"], params["be1"], params["rm1"], params["rv1"])
    s2, b2 = fold_bn(params["g2"], params["be2"], params["rm2"], params["rv2"])
    h = jnp.einsum("nchw,oc->nohw", pooled, params["w1"].reshape(C_MID1, -1))
    h = jnp.maximum(h * s1[None, :, None, None] + b1[None, :, None, None], 0.0)
    z = jnp.einsum("nchw,ochw->no", h, params["w2"])                    # 2x2 conv -> (N, 768)
    z = jnp.maximum(z * s2[None, :] + b2[None, :], 0.0)
    return z @ params["wc"].T + params["bc"][None, :]


def init_params(C, num_classes, key):
    ks = jax.random.split(key, 12)
    f32 = jnp.float32
    return {
        # Conv2d(C, 128, 1, bias=False)
        "w1": 0.1 * jax.random.normal(ks[0], (C_MID1, C, 1, 1), f32),
        # BatchNorm2d(128) params + running stats
        "g1": 1.0 + 0.1 * jax.random.normal(ks[1], (C_MID1,), f32),
        "be1": 0.1 * jax.random.normal(ks[2], (C_MID1,), f32),
        "rm1": 0.1 * jax.random.normal(ks[3], (C_MID1,), f32),
        "rv1": jax.random.uniform(ks[4], (C_MID1,), f32, 0.5, 1.5),
        # Conv2d(128, 768, 2, bias=False)
        "w2": 0.05 * jax.random.normal(ks[5], (C_MID2, C_MID1, 2, 2), f32),
        # BatchNorm2d(768)
        "g2": 1.0 + 0.1 * jax.random.normal(ks[6], (C_MID2,), f32),
        "be2": 0.1 * jax.random.normal(ks[7], (C_MID2,), f32),
        "rm2": 0.1 * jax.random.normal(ks[8], (C_MID2,), f32),
        "rv2": jax.random.uniform(ks[9], (C_MID2,), f32, 0.5, 1.5),
        # Linear(768, num_classes)
        "wc": 0.05 * jax.random.normal(ks[10], (num_classes, C_MID2), f32),
        "bc": 0.1 * jax.random.normal(ks[11], (num_classes,), f32),
    }


if __name__ == "__main__":
    N, C, H, W = 2, 4, 7, 7          # aux-head input (see NOTE above re: 7x7 vs docstring)
    num_classes = 10

    key = jax.random.PRNGKey(0)
    pkey, xkey, xkey2 = jax.random.split(key, 3)
    params = init_params(C, num_classes, pkey)
    x = jax.random.normal(xkey, (N, C, H, W), jnp.float32)

    # f32 path, small batch
    out = jax.block_until_ready(aux_head_forward(x, params))
    assert out.shape == (N, num_classes)
    np.testing.assert_allclose(np.asarray(out), np.asarray(ref_forward(x, params)),
                               rtol=1e-4, atol=1e-4)

    # f32 path, larger batch exercising the multi-tile "parallel" batch grid + padding
    xb = jax.random.normal(xkey2, (300, C, H, W), jnp.float32)
    outb = jax.block_until_ready(aux_head_forward(xb, params))
    np.testing.assert_allclose(np.asarray(outb), np.asarray(ref_forward(xb, params)),
                               rtol=1e-4, atol=1e-4)

    # bf16 matmul operands with f32 accumulation (fast MXU path); loose tolerance.
    out_bf16 = jax.block_until_ready(
        aux_head_forward(x, params, compute_dtype=jnp.bfloat16))
    np.testing.assert_allclose(np.asarray(out_bf16), np.asarray(ref_forward(x, params)),
                               rtol=1e-1, atol=1e-1)

    print("KERNEL_OK")
</pallas_src>

<mosaic_0001>
module attributes {stable_mosaic.version = 11 : i64} {
  func.func @aux_head_kernel(%arg0: i32, %arg1: memref<8x196xf32, #tpu.memory_space<vmem>>, %arg2: memref<196x512xf32, #tpu.memory_space<vmem>>, %arg3: memref<1x512xf32, #tpu.memory_space<vmem>>, %arg4: memref<512x768xf32, #tpu.memory_space<vmem>>, %arg5: memref<1x768xf32, #tpu.memory_space<vmem>>, %arg6: memref<768x128xf32, #tpu.memory_space<vmem>>, %arg7: memref<1x128xf32, #tpu.memory_space<vmem>>, %arg8: memref<8x128xf32, #tpu.memory_space<vmem>>) attributes {dimension_semantics = [#tpu.dimension_semantics<parallel>], iteration_bounds = array<i64: 1>, scalar_prefetch = 0 : i64, scratch_operands = 0 : i64, tpu.core_type = #tpu.core_type<tc>, window_params = [{transform_indices = @transform_0, window_bounds = array<i64: 8, 196>}, {pipeline_mode = #tpu.pipeline_mode<synchronous>, transform_indices = @transform_1, window_bounds = array<i64: 196, 512>}, {pipeline_mode = #tpu.pipeline_mode<synchronous>, transform_indices = @transform_2, window_bounds = array<i64: 1, 512>}, {pipeline_mode = #tpu.pipeline_mode<synchronous>, transform_indices = @transform_3, window_bounds = array<i64: 512, 768>}, {pipeline_mode = #tpu.pipeline_mode<synchronous>, transform_indices = @transform_4, window_bounds = array<i64: 1, 768>}, {pipeline_mode = #tpu.pipeline_mode<synchronous>, transform_indices = @transform_5, window_bounds = array<i64: 768, 128>}, {pipeline_mode = #tpu.pipeline_mode<synchronous>, transform_indices = @transform_6, window_bounds = array<i64: 1, 128>}, {transform_indices = @transform_7, window_bounds = array<i64: 8, 128>}]} {
    %c0 = arith.constant 0 : index
    %c0_0 = arith.constant 0 : index
    %0 = vector.load %arg1[%c0, %c0_0] : memref<8x196xf32, #tpu.memory_space<vmem>>, vector<8x196xf32>
    %cst = arith.constant 0.000000e+00 : f32
    %1 = vector.broadcast %cst : f32 to vector<8x196xf32>
    %2 = arith.maximumf %0, %1 : vector<8x196xf32>
    %c0_1 = arith.constant 0 : index
    %c0_2 = arith.constant 0 : index
    %3 = vector.load %arg2[%c0_1, %c0_2] : memref<196x512xf32, #tpu.memory_space<vmem>>, vector<196x512xf32>
    %cst_3 = arith.constant dense<0.000000e+00> : vector<8x512xf32>
    %4 = tpu.matmul %2, %3, %cst_3 {dimension_numbers = #tpu.dot_dimension_numbers<[1], [0], [0], [1], [0, 0, 1, 1], [], []>} : vector<8x196xf32>, vector<196x512xf32>, vector<8x512xf32> -> vector<8x512xf32>
    %c0_4 = arith.constant 0 : index
    %c0_5 = arith.constant 0 : index
    %5 = vector.load %arg3[%c0_4, %c0_5] : memref<1x512xf32, #tpu.memory_space<vmem>>, vector<1x512xf32>
    %6 = vector.broadcast %5 : vector<1x512xf32> to vector<8x512xf32>
    %7 = arith.addf %4, %6 : vector<8x512xf32>
    %cst_6 = arith.constant 0.000000e+00 : f32
    %8 = vector.broadcast %cst_6 : f32 to vector<8x512xf32>
    %9 = arith.maximumf %7, %8 : vector<8x512xf32>
    %c0_7 = arith.constant 0 : index
    %c0_8 = arith.constant 0 : index
    %10 = vector.load %arg4[%c0_7, %c0_8] : memref<512x768xf32, #tpu.memory_space<vmem>>, vector<512x768xf32>
    %cst_9 = arith.constant dense<0.000000e+00> : vector<8x768xf32>
    %11 = tpu.matmul %9, %10, %cst_9 {dimension_numbers = #tpu.dot_dimension_numbers<[1], [0], [0], [1], [0, 0, 1, 1], [], []>} : vector<8x512xf32>, vector<512x768xf32>, vector<8x768xf32> -> vector<8x768xf32>
    %c0_10 = arith.constant 0 : index
    %c0_11 = arith.constant 0 : index
    %12 = vector.load %arg5[%c0_10, %c0_11] : memref<1x768xf32, #tpu.memory_space<vmem>>, vector<1x768xf32>
    %13 = vector.broadcast %12 : vector<1x768xf32> to vector<8x768xf32>
    %14 = arith.addf %11, %13 : vector<8x768xf32>
    %cst_12 = arith.constant 0.000000e+00 : f32
    %15 = vector.broadcast %cst_12 : f32 to vector<8x768xf32>
    %16 = arith.maximumf %14, %15 : vector<8x768xf32>
    %c0_13 = arith.constant 0 : index
    %c0_14 = arith.constant 0 : index
    %17 = vector.load %arg6[%c0_13, %c0_14] : memref<768x128xf32, #tpu.memory_space<vmem>>, vector<768x128xf32>
    %cst_15 = arith.constant dense<0.000000e+00> : vector<8x128xf32>
    %18 = tpu.matmul %16, %17, %cst_15 {dimension_numbers = #tpu.dot_dimension_numbers<[1], [0], [0], [1], [0, 0, 1, 1], [], []>} : vector<8x768xf32>, vector<768x128xf32>, vector<8x128xf32> -> vector<8x128xf32>
    %c0_16 = arith.constant 0 : index
    %c0_17 = arith.constant 0 : index
    %19 = vector.load %arg7[%c0_16, %c0_17] : memref<1x128xf32, #tpu.memory_space<vmem>>, vector<1x128xf32>
    %20 = vector.broadcast %19 : vector<1x128xf32> to vector<8x128xf32>
    %21 = arith.addf %18, %20 : vector<8x128xf32>
    %c0_18 = arith.constant 0 : index
    %c0_19 = arith.constant 0 : index
    %22 = vector.load %arg8[%c0_18, %c0_19] : memref<8x128xf32, #tpu.memory_space<vmem>>, vector<8x128xf32>
    tpu.vector_store %arg8[%c0_18, %c0_19], %21 {strides = array<i32>} : memref<8x128xf32, #tpu.memory_space<vmem>>, vector<8x128xf32>,
    return
  }
  func.func @transform_0(%arg0: i32) -> (i32, i32) {
    %c0_i32 = arith.constant 0 : i32
    %c0_i32_0 = arith.constant 0 : i32
    return %arg0, %c0_i32 : i32, i32
  }
  func.func @transform_1(%arg0: i32) -> (i32, i32) {
    %c0_i32 = arith.constant 0 : i32
    %c0_i32_0 = arith.constant 0 : i32
    %c0_i32_1 = arith.constant 0 : i32
    return %c0_i32, %c0_i32_0 : i32, i32
  }
  func.func @transform_2(%arg0: i32) -> (i32, i32) {
    %c0_i32 = arith.constant 0 : i32
    %c0_i32_0 = arith.constant 0 : i32
    %c0_i32_1 = arith.constant 0 : i32
    return %c0_i32, %c0_i32_0 : i32, i32
  }
  func.func @transform_3(%arg0: i32) -> (i32, i32) {
    %c0_i32 = arith.constant 0 : i32
    %c0_i32_0 = arith.constant 0 : i32
    %c0_i32_1 = arith.constant 0 : i32
    return %c0_i32, %c0_i32_0 : i32, i32
  }
  func.func @transform_4(%arg0: i32) -> (i32, i32) {
    %c0_i32 = arith.constant 0 : i32
    %c0_i32_0 = arith.constant 0 : i32
    %c0_i32_1 = arith.constant 0 : i32
    return %c0_i32, %c0_i32_0 : i32, i32
  }
  func.func @transform_5(%arg0: i32) -> (i32, i32) {
    %c0_i32 = arith.constant 0 : i32
    %c0_i32_0 = arith.constant 0 : i32
    %c0_i32_1 = arith.constant 0 : i32
    return %c0_i32, %c0_i32_0 : i32, i32
  }
  func.func @transform_6(%arg0: i32) -> (i32, i32) {
    %c0_i32 = arith.constant 0 : i32
    %c0_i32_0 = arith.constant 0 : i32
    %c0_i32_1 = arith.constant 0 : i32
    return %c0_i32, %c0_i32_0 : i32, i32
  }
  func.func @transform_7(%arg0: i32) -> (i32, i32) {
    %c0_i32 = arith.constant 0 : i32
    %c0_i32_0 = arith.constant 0 : i32
    return %arg0, %c0_i32 : i32, i32
  }
}

</mosaic_0001>

<bundles_post_ra>
// kernel: tpu_custom_call.1
= control target key start
LH: loop header
LB: loop body
LE: loop exit
PB: predicated region body
PF: predicated region fallthrough
CT: control target
= control target key end

     0   :  { %12 = vsyncpa [#allocation3], 0  ;;  %s2009_s0 = inlined_call_operand.hbm [shape: f32[8,196], index: 0, kind: input, shape index: {}]   ;;  %s2010_s1 = inlined_call_operand.hbm [shape: f32[196,512], index: 1, kind: input, shape index: {}]   ;;  %s2011_s2 = inlined_call_operand.hbm [shape: f32[1,512], index: 2, kind: input, shape index: {}]   ;;  %s2012_s3 = inlined_call_operand.hbm [shape: f32[512,768], index: 3, kind: input, shape index: {}]   ;;  %s2013_s4 = inlined_call_operand.hbm [shape: f32[1,768], index: 4, kind: input, shape index: {}]   ;;  %s2014_s5 = inlined_call_operand.hbm [shape: f32[768,128], index: 5, kind: input, shape index: {}]   ;;  %s2015_s6 = inlined_call_operand.hbm [shape: f32[1,128], index: 6, kind: input, shape index: {}]   ;;  %s2016_s7 = inlined_call_operand.hbm [shape: f32[8,128], index: 7, kind: output, shape index: {}]  }
   0x1   :  { %13 = vsyncpa [#allocation6], 0 }
   0x2   :  { %14 = vsyncpa [#allocation9], 0 }
   0x3   :  { %15 = vsyncpa [#allocation12], 0 }
   0x4   :  { %16 = vsyncpa [#allocation4], 0  ;;  %s1879_s24 = smov [#allocation5]  }
   0x5   :  { %s32_s25 = sshll.u32 %s1879_s24, 4  ;;  %s33_s25 = int_to_ptr.vmem [resolvable:$true] %s32_s25 }
   0x6   :  { %s1717_s26 = scalar_lea.vmem %s33_s25, 12800  ;;  %p1722_p1 = scmp.lt.s32.totalorder %s33_s25, %s33_s25 }
   0x7   :  { %p1718_p0 = scmp.ne.s32.totalorder %s33_s25, %s1717_s26  ;;  %p1723_p2 = scmp.lt.s32.totalorder %s1717_s26, %s1717_s26 }
   0x9   :  { %p1724_p3 = por %p1723_p2, %p1722_p1 }
   0xb   :  { %p1725_p4 = pnand %p1724_p3, %p1718_p0 }
   0xd   :  { %1728 = shalt.err (!%p1725_p4)
}
   0xe   :  { %s1880_s27 = smov 512   ;;  %s1881_s28 = smov 32  }
   0xf   :  { %38 = dma.hbm_to_vmem [thread:$0]  %s2010_s1, 12800, %s33_s25, [#allocation6], %s1880_s27, %s1880_s27, %s1881_s28  }
  0x10   :  { %s1882_s8 = smov [#allocation8]  }
  0x11   :  { %s54_s9 = sshll.u32 %s1882_s8, 4  ;;  %s55_s9 = int_to_ptr.vmem [resolvable:$true] %s54_s9 }
  0x12   :  { %s1737_s10 = scalar_lea.vmem %s55_s9, 49152  ;;  %p1742_p6 = scmp.lt.s32.totalorder %s55_s9, %s55_s9 }
  0x13   :  { %p1738_p5 = scmp.ne.s32.totalorder %s55_s9, %s1737_s10  ;;  %p1743_p7 = scmp.lt.s32.totalorder %s1737_s10, %s1737_s10 }
  0x15   :  { %p1744_p8 = por %p1743_p7, %p1742_p6 }
  0x17   :  { %p1745_p9 = pnand %p1744_p8, %p1738_p5 }
  0x19   :  { %1748 = shalt.err (!%p1745_p9)
}
  0x1a   :  { %s1883_s11 = smov 768   ;;  %s1884_s12 = smov 48  }
  0x1b   :  { %60 = dma.hbm_to_vmem [thread:$0]  %s2012_s3, 49152, %s55_s9, [#allocation9], %s1883_s11, %s1883_s11, %s1884_s12  }
  0x1c   :  { %s1885_s15 = smov [#allocation11]  }
  0x1d   :  { %s76_s16 = sshll.u32 %s1885_s15, 4  ;;  %s77_s16 = int_to_ptr.vmem [resolvable:$true] %s76_s16 }
  0x1e   :  { %s1757_s1 = scalar_lea.vmem %s77_s16, 12288  ;;  %p1762_p11 = scmp.lt.s32.totalorder %s77_s16, %s77_s16 }
  0x1f   :  { %p1758_p10 = scmp.ne.s32.totalorder %s77_s16, %s1757_s1  ;;  %p1763_p12 = scmp.lt.s32.totalorder %s1757_s1, %s1757_s1 }
  0x21   :  { %p1764_p13 = por %p1763_p12, %p1762_p11 }
  0x23   :  { %p1765_p0 = pnand %p1764_p13, %p1758_p10 }
  0x25   :  { %1768 = shalt.err (!%p1765_p0)
}
  0x26   :  { %s1886_s17 = smov 128   ;;  %s1887_s18 = smov 8  }
  0x27   :  { %82 = dma.hbm_to_vmem [thread:$0]  %s2014_s5, 12288, %s77_s16, [#allocation12], %s1886_s17, %s1886_s17, %s1887_s18  }
  0x28   :  { %s1888_s21 = smov [#allocation2]   ;;  %s1889_s3 = smov [#allocation7]  }
  0x29   :  { %s23_s22 = sshll.u32 %s1888_s21, 4  ;;  %s45_s23 = sshll.u32 %s1889_s3, 4  ;;  %s24_s22 = int_to_ptr.vmem [resolvable:$true] %s23_s22  ;;  %s46_s23 = int_to_ptr.vmem [resolvable:$true] %s45_s23 }
  0x2a   :  { %s1777_s24 = scalar_lea.vmem %s24_s22, 256  ;;  %p1782_p2 = scmp.lt.s32.totalorder %s24_s22, %s24_s22 }
  0x2b   :  { %p1778_p1 = scmp.ne.s32.totalorder %s24_s22, %s1777_s24  ;;  %p1783_p3 = scmp.lt.s32.totalorder %s1777_s24, %s1777_s24 }
  0x2d   :  { %p1784_p4 = por %p1783_p3, %p1782_p2 }
  0x2f   :  { %p1785_p5 = pnand %p1784_p4, %p1778_p1 }
  0x31   :  { %1788 = shalt.err (!%p1785_p5)
}
  0x32   :  { %26 = dma.hbm_to_vmem [thread:$0]  %s2009_s0, 256, %s24_s22, [#allocation3]  }
  0x33   :  { %s1797_s27 = scalar_lea.vmem %s46_s23, 64  ;;  %p1802_p7 = scmp.lt.s32.totalorder %s46_s23, %s46_s23 }
  0x34   :  { %p1798_p6 = scmp.ne.s32.totalorder %s46_s23, %s1797_s27  ;;  %p1803_p8 = scmp.lt.s32.totalorder %s1797_s27, %s1797_s27 }
  0x36   :  { %p1804_p9 = por %p1803_p8, %p1802_p7 }
  0x38   :  { %p1805_p10 = pnand %p1804_p9, %p1798_p6 }
  0x3a   :  { %1808 = shalt.err (!%p1805_p10)
}
  0x3b   :  { %48 = dma.hbm_to_vmem [thread:$0]  %s2011_s2, 64, %s46_s23, [#allocation6]  }
  0x3c   :  { %s1890_s29 = smov [#allocation10]   ;;  %s1891_s8 = smov [#allocation13]  }
  0x3d   :  { %s67_s30 = sshll.u32 %s1890_s29, 4  ;;  %s89_s9 = sshll.u32 %s1891_s8, 4  ;;  %s68_s30 = int_to_ptr.vmem [resolvable:$true] %s67_s30  ;;  %s90_s9 = int_to_ptr.vmem [resolvable:$true] %s89_s9 }
  0x3e   :  { %s1817_s10 = scalar_lea.vmem %s68_s30, 96  ;;  %p1822_p12 = scmp.lt.s32.totalorder %s68_s30, %s68_s30 }
  0x3f   :  { %p1818_p11 = scmp.ne.s32.totalorder %s68_s30, %s1817_s10  ;;  %p1823_p13 = scmp.lt.s32.totalorder %s1817_s10, %s1817_s10 }
  0x41   :  { %p1824_p0 = por %p1823_p13, %p1822_p12 }
  0x43   :  { %p1825_p1 = pnand %p1824_p0, %p1818_p11 }
  0x45   :  { %1828 = shalt.err (!%p1825_p1)
}
  0x46   :  { %70 = dma.hbm_to_vmem [thread:$0]  %s2013_s4, 96, %s68_s30, [#allocation9]  }
  0x47   :  { %s1837_s12 = scalar_lea.vmem %s90_s9, 16  ;;  %s1841_s2 = scalar_lea.vmem %s90_s9, 32 }
  0x48   :  { %p1838_p2 = scmp.ne.s32.totalorder %s90_s9, %s1837_s12  ;;  %p1842_p3 = scmp.lt.s32.totalorder %s90_s9, %s90_s9 }
  0x49   :  { %p1843_p4 = scmp.lt.s32.totalorder %s1841_s2, %s1837_s12 }
  0x4b   :  { %p1844_p5 = por %p1843_p4, %p1842_p3 }
  0x4d   :  { %p1845_p6 = pnand %p1844_p5, %p1838_p2 }
  0x4f   :  { %1848 = shalt.err (!%p1845_p6)
}
  0x50   :  { %92 = dma.hbm_to_vmem [thread:$0]  %s2015_s6, 16, %s90_s9, [#allocation12]  }
  0x51   :  { %1869 = dma.done.wait [#allocation3], 256  }
  0x52   :  { %1870 = vsyncadd [#allocation3], 4294967040 }
  0x53   :  { %1871 = dma.done.wait [#allocation6], 12864  }
  0x54   :  { %1872 = vsyncadd [#allocation6], 4294954432 }
  0x55   :  { %1873 = dma.done.wait [#allocation9], 49248  }
  0x56   :  { %1874 = vsyncadd [#allocation9], 4294918048 }
  0x57   :  { %1875 = dma.done.wait [#allocation12], 12304  }
  0x58   :  { %1876 = vsyncadd [#allocation12], 4294954992  ;;  %v179_v0 = vld [vmem:[#allocation5 + $0x1e8] sm:$0xff]  ;;  %v181_v1 = vld [vmem:[#allocation5 + $0x1f8] sm:$0xff]  ;;  %vm244_vm0 = vcmask 1043456   ;;  %vm240_vm1 = vcmask 556032  }
  0x59   :  { %v178_v2 = vld [vmem:[#allocation5 + $0x1e0] sm:$0xff]  ;;  %257 = vmatprep.subr.mxu0 %v179_v0  ;;  %328 = vmatprep.subr.mxu1 %v181_v1  ;;  %v180_v3 = vld [vmem:[#allocation5 + $0x1f0] sm:$0xff]  ;;  %v175_v4 = vld [vmem:[#allocation5 + $0x1c8] sm:$0xff]  ;;  %s1892_s4 = smov [#allocation14]  }
  0x5a   :  { %v177_v5 = vld [vmem:[#allocation5 + $0x1d8] sm:$0xff]  ;;  %258 = vmatpush1.msra.mxu0 %v178_v2  ;;  %329 = vmatpush1.msra.mxu1 %v180_v3  ;;  %v174_v6 = vld [vmem:[#allocation5 + $0x1c0] sm:$0xff]  ;;  %v176_v7 = vld [vmem:[#allocation5 + $0x1d0] sm:$0xff]  ;;  %s1571_s6 = sshll.u32 %s1892_s4, 4  ;;  %s1572_s6 = int_to_ptr.vmem [resolvable:$true] %s1571_s6 }
  0x5b   :  { %v171_v8 = vld [vmem:[#allocation5 + $0x1a8] sm:$0xff]  ;;  %259 = vmatprep.subr.mxu0 %v175_v4  ;;  %330 = vmatprep.subr.mxu1 %v177_v5  ;;  %v173_v9 = vld [vmem:[#allocation5 + $0x1b8] sm:$0xff]  ;;  %v170_v10 = vld [vmem:[#allocation5 + $0x1a0] sm:$0xff]  ;;  %s1849_s15 = scalar_lea.vmem %s1572_s6, 128  ;;  %p1854_p8 = scmp.lt.s32.totalorder %s1572_s6, %s1572_s6 }
  0x5c   :  { %v172_v11 = vld [vmem:[#allocation5 + $0x1b0] sm:$0xff]  ;;  %260 = vmatpush1.msra.mxu0 %v174_v6  ;;  %331 = vmatpush1.msra.mxu1 %v176_v7  ;;  %v167_v12 = vld [vmem:[#allocation5 + $0x188] sm:$0xff]  ;;  %v169_v13 = vld [vmem:[#allocation5 + $0x198] sm:$0xff]  ;;  %p1850_p7 = scmp.ne.s32.totalorder %s1572_s6, %s1849_s15  ;;  %p1855_p9 = scmp.lt.s32.totalorder %s1849_s15, %s1849_s15 }
  0x5d   :  { %261 = vmatprep.subr.mxu0 %v171_v8  ;;  %332 = vmatprep.subr.mxu1 %v173_v9  ;;  %v166_v14 = vld [vmem:[#allocation5 + $0x180] sm:$0xff]  ;;  %v168_v15 = vld [vmem:[#allocation5 + $0x190] sm:$0xff]  ;;  %v163_v16 = vld [vmem:[#allocation5 + $0x168] sm:$0xff] }
  0x5e   :  { %262 = vmatpush1.msra.mxu0 %v170_v10  ;;  %333 = vmatpush1.msra.mxu1 %v172_v11  ;;  %v165_v17 = vld [vmem:[#allocation5 + $0x178] sm:$0xff]  ;;  %v162_v18 = vld [vmem:[#allocation5 + $0x160] sm:$0xff]  ;;  %v164_v19 = vld [vmem:[#allocation5 + $0x170] sm:$0xff]  ;;  %p1856_p10 = por %p1855_p9, %p1854_p8 }
  0x5f   :  { %263 = vmatprep.subr.mxu0 %v167_v12  ;;  %334 = vmatprep.subr.mxu1 %v169_v13  ;;  %v159_v20 = vld [vmem:[#allocation5 + $0x148] sm:$0xff]  ;;  %v161_v21 = vld [vmem:[#allocation5 + $0x158] sm:$0xff]  ;;  %v158_v22 = vld [vmem:[#allocation5 + $0x140] sm:$0xff] }
  0x60   :  { %264 = vmatpush1.msra.mxu0 %v166_v14  ;;  %335 = vmatpush1.msra.mxu1 %v168_v15  ;;  %v160_v23 = vld [vmem:[#allocation5 + $0x150] sm:$0xff]  ;;  %v155_v24 = vld [vmem:[#allocation5 + $0x128] sm:$0xff]  ;;  %v157_v25 = vld [vmem:[#allocation5 + $0x138] sm:$0xff]  ;;  %p1857_p11 = pnand %p1856_p10, %p1850_p7 }
  0x61   :  { %265 = vmatprep.subr.mxu0 %v163_v16  ;;  %336 = vmatprep.subr.mxu1 %v165_v17  ;;  %v154_v26 = vld [vmem:[#allocation5 + $0x120] sm:$0xff]  ;;  %v156_v27 = vld [vmem:[#allocation5 + $0x130] sm:$0xff]  ;;  %v151_v28 = vld [vmem:[#allocation5 + $0x108] sm:$0xff] }
  0x62   :  { %266 = vmatpush1.msra.mxu0 %v162_v18  ;;  %337 = vmatpush1.msra.mxu1 %v164_v19  ;;  %v153_v29 = vld [vmem:[#allocation5 + $0x118] sm:$0xff]  ;;  %v150_v30 = vld [vmem:[#allocation5 + $0x100] sm:$0xff]  ;;  %v152_v31 = vld [vmem:[#allocation5 + $0x110] sm:$0xff] }
  0x63   :  { %267 = vmatprep.subr.mxu0 %v159_v20  ;;  %338 = vmatprep.subr.mxu1 %v161_v21  ;;  %v147_v32 = vld [vmem:[#allocation5 + $0xe8] sm:$0xff]  ;;  %v149_v33 = vld [vmem:[#allocation5 + $0xf8] sm:$0xff]  ;;  %v146_v34 = vld [vmem:[#allocation5 + $0xe0] sm:$0xff] }
  0x64   :  { %268 = vmatpush1.msra.mxu0 %v158_v22  ;;  %339 = vmatpush1.msra.mxu1 %v160_v23  ;;  %v148_v35 = vld [vmem:[#allocation5 + $0xf0] sm:$0xff]  ;;  %v143_v36 = vld [vmem:[#allocation5 + $0xc8] sm:$0xff]  ;;  %v145_v37 = vld [vmem:[#allocation5 + $0xd8] sm:$0xff] }
  0x65   :  { %269 = vmatprep.subr.mxu0 %v155_v24  ;;  %340 = vmatprep.subr.mxu1 %v157_v25  ;;  %v142_v38 = vld [vmem:[#allocation5 + $0xc0] sm:$0xff]  ;;  %v144_v39 = vld [vmem:[#allocation5 + $0xd0] sm:$0xff]  ;;  %v139_v40 = vld [vmem:[#allocation5 + $0xa8] sm:$0xff] }
  0x66   :  { %270 = vmatpush1.msra.mxu0 %v154_v26  ;;  %341 = vmatpush1.msra.mxu1 %v156_v27  ;;  %v141_v41 = vld [vmem:[#allocation5 + $0xb8] sm:$0xff]  ;;  %v138_v42 = vld [vmem:[#allocation5 + $0xa0] sm:$0xff]  ;;  %v140_v43 = vld [vmem:[#allocation5 + $0xb0] sm:$0xff] }
  0x67   :  { %271 = vmatprep.subr.mxu0 %v151_v28  ;;  %342 = vmatprep.subr.mxu1 %v153_v29  ;;  %v135_v44 = vld [vmem:[#allocation5 + $0x88] sm:$0xff]  ;;  %v137_v45 = vld [vmem:[#allocation5 + $0x98] sm:$0xff]  ;;  %v134_v46 = vld [vmem:[#allocation5 + $0x80] sm:$0xff] }
  0x68   :  { %272 = vmatpush1.msra.mxu0 %v150_v30  ;;  %343 = vmatpush1.msra.mxu1 %v152_v31  ;;  %v136_v47 = vld [vmem:[#allocation5 + $0x90] sm:$0xff]  ;;  %v131_v48 = vld [vmem:[#allocation5 + $0x68] sm:$0xff]  ;;  %v133_v49 = vld [vmem:[#allocation5 + $0x78] sm:$0xff] }
  0x69   :  { %273 = vmatprep.subr.mxu0 %v147_v32  ;;  %344 = vmatprep.subr.mxu1 %v149_v33  ;;  %v130_v50 = vld [vmem:[#allocation5 + $0x60] sm:$0xff]  ;;  %v132_v51 = vld [vmem:[#allocation5 + $0x70] sm:$0xff]  ;;  %v127_v52 = vld [vmem:[#allocation5 + $0x48] sm:$0xff] }
  0x6a   :  { %274 = vmatpush1.msra.mxu0 %v146_v34  ;;  %345 = vmatpush1.msra.mxu1 %v148_v35  ;;  %v129_v53 = vld [vmem:[#allocation5 + $0x58] sm:$0xff]  ;;  %v126_v54 = vld [vmem:[#allocation5 + $0x40] sm:$0xff]  ;;  %v128_v55 = vld [vmem:[#allocation5 + $0x50] sm:$0xff] }
  0x6b   :  { %275 = vmatprep.subr.mxu0 %v143_v36  ;;  %346 = vmatprep.subr.mxu1 %v145_v37  ;;  %v123_v56 = vld [vmem:[#allocation5 + $0x28] sm:$0xff]  ;;  %v125_v57 = vld [vmem:[#allocation5 + $0x38] sm:$0xff]  ;;  %v122_v58 = vld [vmem:[#allocation5 + $0x20] sm:$0xff] }
  0x6c   :  { %276 = vmatpush1.msra.mxu0 %v142_v38  ;;  %347 = vmatpush1.msra.mxu1 %v144_v39  ;;  %v124_v59 = vld [vmem:[#allocation5 + $0x30] sm:$0xff]  ;;  %v119_v60 = vld [vmem:[#allocation5 + $0x8] sm:$0xff]  ;;  %v121_v61 = vld [vmem:[#allocation5 + $0x18] sm:$0xff] }
  0x6d   :  { %277 = vmatprep.subr.mxu0 %v139_v40  ;;  %348 = vmatprep.subr.mxu1 %v141_v41  ;;  %v118_v62 = vld [vmem:[#allocation5] sm:$0xff]  ;;  %v120_v63 = vld [vmem:[#allocation5 + $0x10] sm:$0xff]  ;;  %v215_v0 = vld [vmem:[#allocation5 + $0x308] sm:$0xf] }
  0x6e   :  { %278 = vmatpush1.msra.mxu0 %v138_v42  ;;  %349 = vmatpush1.msra.mxu1 %v140_v43  ;;  %v217_v1 = vld [vmem:[#allocation5 + $0x318] sm:$0xf]  ;;  %v214_v2 = vld [vmem:[#allocation5 + $0x300] sm:$0xf]  ;;  %v216_v3 = vld [vmem:[#allocation5 + $0x310] sm:$0xf] }
  0x6f   :  { %279 = vmatprep.subr.mxu0 %v135_v44  ;;  %350 = vmatprep.subr.mxu1 %v137_v45  ;;  %v211_v4 = vld [vmem:[#allocation5 + $0x2e8] sm:$0xff]  ;;  %v213_v5 = vld [vmem:[#allocation5 + $0x2f8] sm:$0xff]  ;;  %v210_v6 = vld [vmem:[#allocation5 + $0x2e0] sm:$0xff] }
  0x70   :  { %280 = vmatpush1.msra.mxu0 %v134_v46  ;;  %351 = vmatpush1.msra.mxu1 %v136_v47  ;;  %v212_v7 = vld [vmem:[#allocation5 + $0x2f0] sm:$0xff]  ;;  %v207_v8 = vld [vmem:[#allocation5 + $0x2c8] sm:$0xff]  ;;  %v209_v9 = vld [vmem:[#allocation5 + $0x2d8] sm:$0xff] }
  0x71   :  { %281 = vmatprep.subr.mxu0 %v131_v48  ;;  %352 = vmatprep.subr.mxu1 %v133_v49  ;;  %v206_v10 = vld [vmem:[#allocation5 + $0x2c0] sm:$0xff]  ;;  %v208_v11 = vld [vmem:[#allocation5 + $0x2d0] sm:$0xff]  ;;  %v203_v12 = vld [vmem:[#allocation5 + $0x2a8] sm:$0xff] }
  0x72   :  { %282 = vmatpush1.msra.mxu0 %v130_v50  ;;  %353 = vmatpush1.msra.mxu1 %v132_v51  ;;  %v205_v13 = vld [vmem:[#allocation5 + $0x2b8] sm:$0xff]  ;;  %v202_v14 = vld [vmem:[#allocation5 + $0x2a0] sm:$0xff]  ;;  %v204_v15 = vld [vmem:[#allocation5 + $0x2b0] sm:$0xff] }
  0x73   :  { %283 = vmatprep.subr.mxu0 %v127_v52  ;;  %354 = vmatprep.subr.mxu1 %v129_v53  ;;  %v199_v16 = vld [vmem:[#allocation5 + $0x288] sm:$0xff]  ;;  %v201_v17 = vld [vmem:[#allocation5 + $0x298] sm:$0xff]  ;;  %v198_v18 = vld [vmem:[#allocation5 + $0x280] sm:$0xff] }
  0x74   :  { %284 = vmatpush1.msra.mxu0 %v126_v54  ;;  %355 = vmatpush1.msra.mxu1 %v128_v55  ;;  %v200_v19 = vld [vmem:[#allocation5 + $0x290] sm:$0xff]  ;;  %v195_v20 = vld [vmem:[#allocation5 + $0x268] sm:$0xff]  ;;  %v197_v21 = vld [vmem:[#allocation5 + $0x278] sm:$0xff] }
  0x75   :  { %285 = vmatprep.subr.mxu0 %v123_v56  ;;  %356 = vmatprep.subr.mxu1 %v125_v57  ;;  %v194_v22 = vld [vmem:[#allocation5 + $0x260] sm:$0xff]  ;;  %v196_v23 = vld [vmem:[#allocation5 + $0x270] sm:$0xff]  ;;  %v191_v24 = vld [vmem:[#allocation5 + $0x248] sm:$0xff] }
  0x76   :  { %286 = vmatpush1.msra.mxu0 %v122_v58  ;;  %357 = vmatpush1.msra.mxu1 %v124_v59  ;;  %v193_v25 = vld [vmem:[#allocation5 + $0x258] sm:$0xff]  ;;  %v190_v26 = vld [vmem:[#allocation5 + $0x240] sm:$0xff]  ;;  %v192_v27 = vld [vmem:[#allocation5 + $0x250] sm:$0xff] }
  0x77   :  { %287 = vmatprep.subr.mxu0 %v119_v60  ;;  %358 = vmatprep.subr.mxu1 %v121_v61  ;;  %v115_v28 = vld [vmem:[#allocation2 + $0x8] sm:$0xff]  ;;  %v187_v29 = vld [vmem:[#allocation5 + $0x228] sm:$0xff]  ;;  %v186_v31 = vld [vmem:[#allocation5 + $0x220] sm:$0xff] }
  0x78   :  { %288 = vmatpush1.msra.mxu0 %v118_v62  ;;  %359 = vmatpush1.msra.mxu1 %v120_v63  ;;  %v189_v30 = vld [vmem:[#allocation5 + $0x238] sm:$0xff]  ;;  %v188_v32 = vld [vmem:[#allocation5 + $0x230] sm:$0xff]  ;;  %v183_v34 = vld [vmem:[#allocation5 + $0x208] sm:$0xff]  ;;  %v117_v36 = vmax.f32 %v115_v28, 0.0 }
  0x79   :  { %1583 = vmatprep.subr.msk.mxu0 %vm244_vm0, %v215_v0  ;;  %1586 = vmatprep.subr.msk.mxu1 %vm244_vm0, %v217_v1  ;;  %v114_v33 = vld [vmem:[#allocation2] sm:$0xff]  ;;  %v185_v35 = vld [vmem:[#allocation5 + $0x218] sm:$0xff]  ;;  %v182_v37 = vld [vmem:[#allocation5 + $0x200] sm:$0xff] }
  0x7a   :  { %1584 = vmatpush2.msk.msra.mxu0 %vm244_vm0, %v214_v2  ;;  %1587 = vmatpush2.msk.msra.mxu1 %vm244_vm0, %v216_v3  ;;  %v184_v38 = vld [vmem:[#allocation5 + $0x210] sm:$0xff]  ;;  %v116_v39 = vmax.f32 %v114_v33, 0.0  ;;  %v494_v40 = vld [vmem:[#allocation8 + $0x2d8] sm:$0xff]  ;;  %v487_v46 = vld [vmem:[#allocation8 + $0x2a0] sm:$0xff] }
  0x7b   :  { %305 = vmatprep.subr.mxu0 %v211_v4  ;;  %376 = vmatprep.subr.mxu1 %v213_v5  ;;  %v686_v41 = vld [vmem:[#allocation8 + $0x8d8] sm:$0xff]  ;;  %v493_v42 = vld [vmem:[#allocation8 + $0x2d0] sm:$0xff]  ;;  %v488_v44 = vld [vmem:[#allocation8 + $0x2a8] sm:$0xff] }
  0x7c   :  { %306 = vmatpush2.msra.mxu0 %v210_v6  ;;  %377 = vmatpush2.msra.mxu1 %v212_v7  ;;  %v685_v43 = vld [vmem:[#allocation8 + $0x8d0] sm:$0xff]  ;;  %v680_v45 = vld [vmem:[#allocation8 + $0x8a8] sm:$0xff]  ;;  %v679_v47 = vld [vmem:[#allocation8 + $0x8a0] sm:$0xff] }
  0x7d   :  { %307 = vmatprep.subr.mxu0 %v207_v8  ;;  %378 = vmatprep.subr.mxu1 %v209_v9  ;;  %v482_v48 = vld [vmem:[#allocation8 + $0x278] sm:$0xff]  ;;  %v481_v50 = vld [vmem:[#allocation8 + $0x270] sm:$0xff]  ;;  %v476_v52 = vld [vmem:[#allocation8 + $0x248] sm:$0xff] }
  0x7e   :  { %308 = vmatpush2.msra.mxu0 %v206_v10  ;;  %379 = vmatpush2.msra.mxu1 %v208_v11  ;;  %v674_v49 = vld [vmem:[#allocation8 + $0x878] sm:$0xff]  ;;  %v673_v51 = vld [vmem:[#allocation8 + $0x870] sm:$0xff]  ;;  %v668_v53 = vld [vmem:[#allocation8 + $0x848] sm:$0xff] }
  0x7f   :  { %309 = vmatprep.subr.mxu0 %v203_v12  ;;  %380 = vmatprep.subr.mxu1 %v205_v13  ;;  %v475_v54 = vld [vmem:[#allocation8 + $0x240] sm:$0xff]  ;;  %v470_v56 = vld [vmem:[#allocation8 + $0x218] sm:$0xff]  ;;  %v469_v58 = vld [vmem:[#allocation8 + $0x210] sm:$0xff] }
  0x80   :  { %310 = vmatpush2.msra.mxu0 %v202_v14  ;;  %381 = vmatpush2.msra.mxu1 %v204_v15  ;;  %v667_v55 = vld [vmem:[#allocation8 + $0x840] sm:$0xff]  ;;  %v662_v57 = vld [vmem:[#allocation8 + $0x818] sm:$0xff]  ;;  %v661_v59 = vld [vmem:[#allocation8 + $0x810] sm:$0xff] }
  0x81   :  { %311 = vmatprep.subr.mxu0 %v199_v16  ;;  %382 = vmatprep.subr.mxu1 %v201_v17  ;;  %v464_v60 = vld [vmem:[#allocation8 + $0x1e8] sm:$0xff]  ;;  %v463_v62 = vld [vmem:[#allocation8 + $0x1e0] sm:$0xff]  ;;  %v458_v0 = vld [vmem:[#allocation8 + $0x1b8] sm:$0xff] }
  0x82   :  { %312 = vmatpush2.msra.mxu0 %v198_v18  ;;  %383 = vmatpush2.msra.mxu1 %v200_v19  ;;  %v656_v61 = vld [vmem:[#allocation8 + $0x7e8] sm:$0xff]  ;;  %v655_v63 = vld [vmem:[#allocation8 + $0x7e0] sm:$0xff]  ;;  %v650_v1 = vld [vmem:[#allocation8 + $0x7b8] sm:$0xff] }
  0x83   :  { %313 = vmatprep.subr.mxu0 %v195_v20  ;;  %384 = vmatprep.subr.mxu1 %v197_v21  ;;  %v457_v2 = vld [vmem:[#allocation8 + $0x1b0] sm:$0xff]  ;;  %v452_v4 = vld [vmem:[#allocation8 + $0x188] sm:$0xff]  ;;  %v451_v6 = vld [vmem:[#allocation8 + $0x180] sm:$0xff] }
  0x84   :  { %314 = vmatpush2.msra.mxu0 %v194_v22  ;;  %385 = vmatpush2.msra.mxu1 %v196_v23  ;;  %v649_v3 = vld [vmem:[#allocation8 + $0x7b0] sm:$0xff]  ;;  %v644_v5 = vld [vmem:[#allocation8 + $0x788] sm:$0xff]  ;;  %v643_v7 = vld [vmem:[#allocation8 + $0x780] sm:$0xff] }
  0x85   :  { %315 = vmatprep.subr.mxu0 %v191_v24  ;;  %386 = vmatprep.subr.mxu1 %v193_v25  ;;  %v446_v8 = vld [vmem:[#allocation8 + $0x158] sm:$0xff]  ;;  %v445_v10 = vld [vmem:[#allocation8 + $0x150] sm:$0xff]  ;;  %v440_v12 = vld [vmem:[#allocation8 + $0x128] sm:$0xff] }
  0x86   :  { %316 = vmatpush2.msra.mxu0 %v190_v26  ;;  %387 = vmatpush2.msra.mxu1 %v192_v27  ;;  %v638_v9 = vld [vmem:[#allocation8 + $0x758] sm:$0xff]  ;;  %v637_v11 = vld [vmem:[#allocation8 + $0x750] sm:$0xff]  ;;  %v632_v13 = vld [vmem:[#allocation8 + $0x728] sm:$0xff] }
  0x87   :  { %317 = vmatprep.subr.mxu0 %v187_v29  ;;  %388 = vmatprep.subr.mxu1 %v189_v30  ;;  %v439_v14 = vld [vmem:[#allocation8 + $0x120] sm:$0xff]  ;;  %v434_v16 = vld [vmem:[#allocation8 + $0xf8] sm:$0xff]  ;;  %v433_v18 = vld [vmem:[#allocation8 + $0xf0] sm:$0xff] }
  0x88   :  { %318 = vmatpush2.msra.mxu0 %v186_v31  ;;  %389 = vmatpush2.msra.mxu1 %v188_v32  ;;  %v631_v15 = vld [vmem:[#allocation8 + $0x720] sm:$0xff]  ;;  %v626_v17 = vld [vmem:[#allocation8 + $0x6f8] sm:$0xff]  ;;  %v625_v19 = vld [vmem:[#allocation8 + $0x6f0] sm:$0xff] }
  0x89   :  { %319 = vmatprep.subr.mxu0 %v183_v34  ;;  %390 = vmatprep.subr.mxu1 %v185_v35  ;;  %v428_v20 = vld [vmem:[#allocation8 + $0xc8] sm:$0xff]  ;;  %v427_v22 = vld [vmem:[#allocation8 + $0xc0] sm:$0xff]  ;;  %v422_v24 = vld [vmem:[#allocation8 + $0x98] sm:$0xff] }
  0x8a   :  { %320 = vmatpush2.msra.mxu0 %v182_v37  ;;  %1585 = vmatprep.mubr.msk.f32.mxu0 %vm240_vm1, %v117_v36  ;;  %v620_v21 = vld [vmem:[#allocation8 + $0x6c8] sm:$0xff]  ;;  %v619_v23 = vld [vmem:[#allocation8 + $0x6c0] sm:$0xff]  ;;  %v614_v25 = vld [vmem:[#allocation8 + $0x698] sm:$0xff] }
  0x8b   :  { %391 = vmatpush2.msra.mxu1 %v184_v38  ;;  %1588 = vmatprep.mubr.msk.f32.mxu1 %vm240_vm1, %v117_v36  ;;  %v421_v26 = vld [vmem:[#allocation8 + $0x90] sm:$0xff]  ;;  %v416_v28 = vld [vmem:[#allocation8 + $0x68] sm:$0xff]  ;;  %v415_v30 = vld [vmem:[#allocation8 + $0x60] sm:$0xff] }
  0x8c   :  { %322 = vmatmul.mubr.f32.vlgmr.msra.gmra.mxu0 %v116_v39  ;;  %393 = vmatmul.mubr.f32.vlgmr.msra.gmra.mxu1 %v116_v39  ;;  %v613_v27 = vld [vmem:[#allocation8 + $0x690] sm:$0xff]  ;;  %v608_v29 = vld [vmem:[#allocation8 + $0x668] sm:$0xff]  ;;  %v607_v31 = vld [vmem:[#allocation8 + $0x660] sm:$0xff] }
  0x8d   :  { %819 = vmatprep.subr.mxu0 %v494_v40  ;;  %890 = vmatprep.subr.mxu1 %v686_v41  ;;  %v410_v32 = vld [vmem:[#allocation8 + $0x38] sm:$0xff]  ;;  %v409_v34 = vld [vmem:[#allocation8 + $0x30] sm:$0xff]  ;;  %v404_v36 = vld [vmem:[#allocation8 + $0x8] sm:$0xff] }
  0x8e   :  { %820 = vmatpush1.msra.mxu0 %v493_v42  ;;  %891 = vmatpush1.msra.mxu1 %v685_v43  ;;  %v602_v33 = vld [vmem:[#allocation8 + $0x638] sm:$0xff]  ;;  %v601_v35 = vld [vmem:[#allocation8 + $0x630] sm:$0xff]  ;;  %v596_v37 = vld [vmem:[#allocation8 + $0x608] sm:$0xff] }
  0x8f   :  { %821 = vmatprep.subr.mxu0 %v488_v44  ;;  %892 = vmatprep.subr.mxu1 %v680_v45  ;;  %v403_v38 = vld [vmem:[#allocation8] sm:$0xff]  ;;  %v590_v40 = vld [vmem:[#allocation8 + $0x5d8] sm:$0xff]  ;;  %v589_v42 = vld [vmem:[#allocation8 + $0x5d0] sm:$0xff] }
  0x90   :  { %822 = vmatpush1.msra.mxu0 %v487_v46  ;;  %893 = vmatpush1.msra.mxu1 %v679_v47  ;;  %v595_v39 = vld [vmem:[#allocation8 + $0x600] sm:$0xff]  ;;  %v782_v41 = vld [vmem:[#allocation8 + $0xbd8] sm:$0xff]  ;;  %v781_v43 = vld [vmem:[#allocation8 + $0xbd0] sm:$0xff] }
  0x91   :  { %823 = vmatprep.subr.mxu0 %v482_v48  ;;  %894 = vmatprep.subr.mxu1 %v674_v49  ;;  %v584_v44 = vld [vmem:[#allocation8 + $0x5a8] sm:$0xff]  ;;  %v583_v46 = vld [vmem:[#allocation8 + $0x5a0] sm:$0xff]  ;;  %v578_v48 = vld [vmem:[#allocation8 + $0x578] sm:$0xff] }
  0x92   :  { %824 = vmatpush1.msra.mxu0 %v481_v50  ;;  %895 = vmatpush1.msra.mxu1 %v673_v51  ;;  %v776_v45 = vld [vmem:[#allocation8 + $0xba8] sm:$0xff]  ;;  %v775_v47 = vld [vmem:[#allocation8 + $0xba0] sm:$0xff]  ;;  %v770_v49 = vld [vmem:[#allocation8 + $0xb78] sm:$0xff] }
  0x93   :  { %825 = vmatprep.subr.mxu0 %v476_v52  ;;  %896 = vmatprep.subr.mxu1 %v668_v53  ;;  %v577_v50 = vld [vmem:[#allocation8 + $0x570] sm:$0xff]  ;;  %v572_v52 = vld [vmem:[#allocation8 + $0x548] sm:$0xff] }
  0x94   :  { %826 = vmatpush1.msra.mxu0 %v475_v54  ;;  %897 = vmatpush1.msra.mxu1 %v667_v55  ;;  %v769_v51 = vld [vmem:[#allocation8 + $0xb70] sm:$0xff]  ;;  %v764_v53 = vld [vmem:[#allocation8 + $0xb48] sm:$0xff]  ;;  %v571_v54 = vld [vmem:[#allocation8 + $0x540] sm:$0xff] }
  0x95   :  { %827 = vmatprep.subr.mxu0 %v470_v56  ;;  %898 = vmatprep.subr.mxu1 %v662_v57  ;;  %v763_v55 = vld [vmem:[#allocation8 + $0xb40] sm:$0xff]  ;;  %v566_v56 = vld [vmem:[#allocation8 + $0x518] sm:$0xff] }
  0x96   :  { %828 = vmatpush1.msra.mxu0 %v469_v58  ;;  %899 = vmatpush1.msra.mxu1 %v661_v59  ;;  %v758_v57 = vld [vmem:[#allocation8 + $0xb18] sm:$0xff]  ;;  %v565_v58 = vld [vmem:[#allocation8 + $0x510] sm:$0xff] }
  0x97   :  { %829 = vmatprep.subr.mxu0 %v464_v60  ;;  %900 = vmatprep.subr.mxu1 %v656_v61  ;;  %v757_v59 = vld [vmem:[#allocation8 + $0xb10] sm:$0xff]  ;;  %v560_v60 = vld [vmem:[#allocation8 + $0x4e8] sm:$0xff] }
  0x98   :  { %830 = vmatpush1.msra.mxu0 %v463_v62  ;;  %901 = vmatpush1.msra.mxu1 %v655_v63  ;;  %v752_v61 = vld [vmem:[#allocation8 + $0xae8] sm:$0xff]  ;;  %v559_v62 = vld [vmem:[#allocation8 + $0x4e0] sm:$0xff] }
  0x99   :  { %831 = vmatprep.subr.mxu0 %v458_v0  ;;  %902 = vmatprep.subr.mxu1 %v650_v1  ;;  %v751_v63 = vld [vmem:[#allocation8 + $0xae0] sm:$0xff]  ;;  %v554_v0 = vld [vmem:[#allocation8 + $0x4b8] sm:$0xff] }
  0x9a   :  { %832 = vmatpush1.msra.mxu0 %v457_v2  ;;  %903 = vmatpush1.msra.mxu1 %v649_v3  ;;  %v746_v1 = vld [vmem:[#allocation8 + $0xab8] sm:$0xff]  ;;  %v553_v2 = vld [vmem:[#allocation8 + $0x4b0] sm:$0xff] }
  0x9b   :  { %833 = vmatprep.subr.mxu0 %v452_v4  ;;  %904 = vmatprep.subr.mxu1 %v644_v5  ;;  %v745_v3 = vld [vmem:[#allocation8 + $0xab0] sm:$0xff]  ;;  %v548_v4 = vld [vmem:[#allocation8 + $0x488] sm:$0xff] }
  0x9c   :  { %834 = vmatpush1.msra.mxu0 %v451_v6  ;;  %905 = vmatpush1.msra.mxu1 %v643_v7  ;;  %v740_v5 = vld [vmem:[#allocation8 + $0xa88] sm:$0xff]  ;;  %v547_v6 = vld [vmem:[#allocation8 + $0x480] sm:$0xff] }
  0x9d   :  { %835 = vmatprep.subr.mxu0 %v446_v8  ;;  %906 = vmatprep.subr.mxu1 %v638_v9  ;;  %v739_v7 = vld [vmem:[#allocation8 + $0xa80] sm:$0xff]  ;;  %v542_v8 = vld [vmem:[#allocation8 + $0x458] sm:$0xff] }
  0x9e   :  { %836 = vmatpush1.msra.mxu0 %v445_v10  ;;  %907 = vmatpush1.msra.mxu1 %v637_v11  ;;  %v734_v9 = vld [vmem:[#allocation8 + $0xa58] sm:$0xff]  ;;  %v541_v10 = vld [vmem:[#allocation8 + $0x450] sm:$0xff] }
  0x9f   :  { %837 = vmatprep.subr.mxu0 %v440_v12  ;;  %908 = vmatprep.subr.mxu1 %v632_v13  ;;  %v733_v11 = vld [vmem:[#allocation8 + $0xa50] sm:$0xff]  ;;  %v536_v12 = vld [vmem:[#allocation8 + $0x428] sm:$0xff] }
  0xa0   :  { %838 = vmatpush1.msra.mxu0 %v439_v14  ;;  %909 = vmatpush1.msra.mxu1 %v631_v15  ;;  %v728_v13 = vld [vmem:[#allocation8 + $0xa28] sm:$0xff]  ;;  %v535_v14 = vld [vmem:[#allocation8 + $0x420] sm:$0xff] }
  0xa1   :  { %839 = vmatprep.subr.mxu0 %v434_v16  ;;  %910 = vmatprep.subr.mxu1 %v626_v17  ;;  %v727_v15 = vld [vmem:[#allocation8 + $0xa20] sm:$0xff]  ;;  %v530_v16 = vld [vmem:[#allocation8 + $0x3f8] sm:$0xff] }
  0xa2   :  { %840 = vmatpush1.msra.mxu0 %v433_v18  ;;  %911 = vmatpush1.msra.mxu1 %v625_v19  ;;  %v722_v17 = vld [vmem:[#allocation8 + $0x9f8] sm:$0xff]  ;;  %v529_v18 = vld [vmem:[#allocation8 + $0x3f0] sm:$0xff] }
  0xa3   :  { %841 = vmatprep.subr.mxu0 %v428_v20  ;;  %912 = vmatprep.subr.mxu1 %v620_v21  ;;  %v721_v19 = vld [vmem:[#allocation8 + $0x9f0] sm:$0xff]  ;;  %v524_v20 = vld [vmem:[#allocation8 + $0x3c8] sm:$0xff] }
  0xa4   :  { %842 = vmatpush1.msra.mxu0 %v427_v22  ;;  %913 = vmatpush1.msra.mxu1 %v619_v23  ;;  %v716_v21 = vld [vmem:[#allocation8 + $0x9c8] sm:$0xff]  ;;  %v523_v22 = vld [vmem:[#allocation8 + $0x3c0] sm:$0xff] }
  0xa5   :  { %843 = vmatprep.subr.mxu0 %v422_v24  ;;  %914 = vmatprep.subr.mxu1 %v614_v25  ;;  %v715_v23 = vld [vmem:[#allocation8 + $0x9c0] sm:$0xff]  ;;  %v518_v24 = vld [vmem:[#allocation8 + $0x398] sm:$0xff] }
  0xa6   :  { %844 = vmatpush1.msra.mxu0 %v421_v26  ;;  %915 = vmatpush1.msra.mxu1 %v613_v27  ;;  %v710_v25 = vld [vmem:[#allocation8 + $0x998] sm:$0xff]  ;;  %v517_v26 = vld [vmem:[#allocation8 + $0x390] sm:$0xff] }
  0xa7   :  { %845 = vmatprep.subr.mxu0 %v416_v28  ;;  %916 = vmatprep.subr.mxu1 %v608_v29  ;;  %v709_v27 = vld [vmem:[#allocation8 + $0x990] sm:$0xff]  ;;  %v512_v28 = vld [vmem:[#allocation8 + $0x368] sm:$0xff] }
  0xa8   :  { %846 = vmatpush1.msra.mxu0 %v415_v30  ;;  %917 = vmatpush1.msra.mxu1 %v607_v31  ;;  %v704_v29 = vld [vmem:[#allocation8 + $0x968] sm:$0xff]  ;;  %v511_v30 = vld [vmem:[#allocation8 + $0x360] sm:$0xff] }
  0xa9   :  { %847 = vmatprep.subr.mxu0 %v410_v32  ;;  %918 = vmatprep.subr.mxu1 %v602_v33  ;;  %v703_v31 = vld [vmem:[#allocation8 + $0x960] sm:$0xff]  ;;  %v506_v32 = vld [vmem:[#allocation8 + $0x338] sm:$0xff] }
  0xaa   :  { %848 = vmatpush1.msra.mxu0 %v409_v34  ;;  %919 = vmatpush1.msra.mxu1 %v601_v35  ;;  %v698_v33 = vld [vmem:[#allocation8 + $0x938] sm:$0xff]  ;;  %v505_v34 = vld [vmem:[#allocation8 + $0x330] sm:$0xff] }
  0xab   :  { %849 = vmatprep.subr.mxu0 %v404_v36  ;;  %920 = vmatprep.subr.mxu1 %v596_v37  ;;  %v697_v35 = vld [vmem:[#allocation8 + $0x930] sm:$0xff]  ;;  %v500_v36 = vld [vmem:[#allocation8 + $0x308] sm:$0xff] }
  0xac   :  { %850 = vmatpush1.msra.mxu0 %v403_v38  ;;  %921 = vmatpush1.msra.mxu1 %v595_v39  ;;  %v692_v37 = vld [vmem:[#allocation8 + $0x908] sm:$0xff]  ;;  %v499_v38 = vld [vmem:[#allocation8 + $0x300] sm:$0xff] }
  0xad   :  { %851 = vmatprep.subr.mxu0 %v590_v40  ;;  %922 = vmatprep.subr.mxu1 %v782_v41  ;;  %v691_v39 = vld [vmem:[#allocation8 + $0x900] sm:$0xff]  ;;  %v496_v40 = vld [vmem:[#allocation8 + $0x2e8] sm:$0xff] }
  0xae   :  { %852 = vmatpush2.msra.mxu0 %v589_v42  ;;  %923 = vmatpush2.msra.mxu1 %v781_v43  ;;  %v688_v41 = vld [vmem:[#allocation8 + $0x8e8] sm:$0xff]  ;;  %v220_v42 = vlaneseq }
  0xaf   :  { %853 = vmatprep.subr.mxu0 %v584_v44  ;;  %924 = vmatprep.subr.mxu1 %v776_v45 }
  0xb0   :  { %854 = vmatpush2.msra.mxu0 %v583_v46  ;;  %925 = vmatpush2.msra.mxu1 %v775_v47  ;;  %v1954_v43 = vshrl.u32 %v220_v42, 7  ;;  %v218_v46 = vld [vmem:[#allocation7] sm:$0xf]  ;;  %v627_v42 = vld [vmem:[#allocation8 + $0x700] sm:$0xff] }
  0xb1   :  { %855 = vmatprep.subr.mxu0 %v578_v48  ;;  %926 = vmatprep.subr.mxu1 %v770_v49 }
  0xb2   :  { %856 = vmatpush2.msra.mxu0 %v577_v50  ;;  %927 = vmatpush2.msra.mxu1 %v769_v51  ;;  %v230_v44 = vsub.s32 2, %v1954_v43  ;;  %v222_v45 = vsub.s32 0, %v1954_v43  ;;  %v226_v47 = vsub.s32 1, %v1954_v43  ;;  %v234_v48 = vsub.s32 3, %v1954_v43 }
  0xb3   :  { %857 = vmatprep.subr.mxu0 %v572_v52  ;;  %928 = vmatprep.subr.mxu1 %v764_v53 }
  0xb4   :  { %858 = vmatpush2.msra.mxu0 %v571_v54  ;;  %929 = vmatpush2.msra.mxu1 %v763_v55  ;;  %v231_v49 = vrot.slane %v218_v46, %v230_v44  ;;  %v223_v50 = vrot.slane %v218_v46, %v222_v45  ;;  %v227_v51 = vrot.slane %v218_v46, %v226_v47 }
  0xb5   :  { %859 = vmatprep.subr.mxu0 %v566_v56  ;;  %930 = vmatprep.subr.mxu1 %v758_v57  ;;  %v235_v52 = vrot.slane %v218_v46, %v234_v48  ;;  %v430_v46 = vld [vmem:[#allocation8 + $0xd8] sm:$0xff] }
  0xb6   :  { %860 = vmatpush2.msra.mxu0 %v565_v58  ;;  %931 = vmatpush2.msra.mxu1 %v757_v59 }
  0xb7   :  { %861 = vmatprep.subr.mxu0 %v560_v60  ;;  %932 = vmatprep.subr.mxu1 %v752_v61 }
  0xb8   :  { %862 = vmatpush2.msra.mxu0 %v559_v62  ;;  %933 = vmatpush2.msra.mxu1 %v751_v63 }
  0xb9   :  { %863 = vmatprep.subr.mxu0 %v554_v0  ;;  %934 = vmatprep.subr.mxu1 %v746_v1  ;;  %v495_v1 = vld [vmem:[#allocation8 + $0x2e0] sm:$0xff] }
  0xba   :  { %864 = vmatpush2.msra.mxu0 %v553_v2  ;;  %935 = vmatpush2.msra.mxu1 %v745_v3  ;;  %v687_v2 = vld [vmem:[#allocation8 + $0x8e0] sm:$0xff]  ;;  %v490_v3 = vld [vmem:[#allocation8 + $0x2b8] sm:$0xff] }
  0xbb   :  { %865 = vmatprep.subr.mxu0 %v548_v4  ;;  %936 = vmatprep.subr.mxu1 %v740_v5  ;;  %v682_v4 = vld [vmem:[#allocation8 + $0x8b8] sm:$0xff]  ;;  %v489_v5 = vld [vmem:[#allocation8 + $0x2b0] sm:$0xff] }
  0xbc   :  { %866 = vmatpush2.msra.mxu0 %v547_v6  ;;  %937 = vmatpush2.msra.mxu1 %v739_v7  ;;  %v681_v6 = vld [vmem:[#allocation8 + $0x8b0] sm:$0xff]  ;;  %v484_v7 = vld [vmem:[#allocation8 + $0x288] sm:$0xff] }
  0xbd   :  { %867 = vmatprep.subr.mxu0 %v542_v8  ;;  %938 = vmatprep.subr.mxu1 %v734_v9  ;;  %v676_v8 = vld [vmem:[#allocation8 + $0x888] sm:$0xff]  ;;  %v483_v9 = vld [vmem:[#allocation8 + $0x280] sm:$0xff] }
  0xbe   :  { %868 = vmatpush2.msra.mxu0 %v541_v10  ;;  %939 = vmatpush2.msra.mxu1 %v733_v11  ;;  %v675_v10 = vld [vmem:[#allocation8 + $0x880] sm:$0xff]  ;;  %v478_v11 = vld [vmem:[#allocation8 + $0x258] sm:$0xff] }
  0xbf   :  { %869 = vmatprep.subr.mxu0 %v536_v12  ;;  %940 = vmatprep.subr.mxu1 %v728_v13  ;;  %v670_v12 = vld [vmem:[#allocation8 + $0x858] sm:$0xff]  ;;  %v477_v13 = vld [vmem:[#allocation8 + $0x250] sm:$0xff] }
  0xc0   :  { %870 = vmatpush2.msra.mxu0 %v535_v14  ;;  %941 = vmatpush2.msra.mxu1 %v727_v15  ;;  %v669_v14 = vld [vmem:[#allocation8 + $0x850] sm:$0xff]  ;;  %v472_v15 = vld [vmem:[#allocation8 + $0x228] sm:$0xff] }
  0xc1   :  { %871 = vmatprep.subr.mxu0 %v530_v16  ;;  %942 = vmatprep.subr.mxu1 %v722_v17  ;;  %v664_v16 = vld [vmem:[#allocation8 + $0x828] sm:$0xff]  ;;  %v471_v17 = vld [vmem:[#allocation8 + $0x220] sm:$0xff] }
  0xc2   :  { %872 = vmatpush2.msra.mxu0 %v529_v18  ;;  %943 = vmatpush2.msra.mxu1 %v721_v19  ;;  %v663_v18 = vld [vmem:[#allocation8 + $0x820] sm:$0xff]  ;;  %v466_v19 = vld [vmem:[#allocation8 + $0x1f8] sm:$0xff] }
  0xc3   :  { %873 = vmatprep.subr.mxu0 %v524_v20  ;;  %944 = vmatprep.subr.mxu1 %v716_v21  ;;  %v658_v20 = vld [vmem:[#allocation8 + $0x7f8] sm:$0xff]  ;;  %v465_v21 = vld [vmem:[#allocation8 + $0x1f0] sm:$0xff] }
  0xc4   :  { %874 = vmatpush2.msra.mxu0 %v523_v22  ;;  %945 = vmatpush2.msra.mxu1 %v715_v23  ;;  %v657_v22 = vld [vmem:[#allocation8 + $0x7f0] sm:$0xff]  ;;  %v460_v23 = vld [vmem:[#allocation8 + $0x1c8] sm:$0xff] }
  0xc5   :  { %875 = vmatprep.subr.mxu0 %v518_v24  ;;  %946 = vmatprep.subr.mxu1 %v710_v25  ;;  %v652_v24 = vld [vmem:[#allocation8 + $0x7c8] sm:$0xff]  ;;  %v459_v25 = vld [vmem:[#allocation8 + $0x1c0] sm:$0xff] }
  0xc6   :  { %876 = vmatpush2.msra.mxu0 %v517_v26  ;;  %947 = vmatpush2.msra.mxu1 %v709_v27  ;;  %v651_v26 = vld [vmem:[#allocation8 + $0x7c0] sm:$0xff]  ;;  %v454_v27 = vld [vmem:[#allocation8 + $0x198] sm:$0xff] }
  0xc7   :  { %877 = vmatprep.subr.mxu0 %v512_v28  ;;  %948 = vmatprep.subr.mxu1 %v704_v29  ;;  %v646_v28 = vld [vmem:[#allocation8 + $0x798] sm:$0xff]  ;;  %v453_v29 = vld [vmem:[#allocation8 + $0x190] sm:$0xff] }
  0xc8   :  { %878 = vmatpush2.msra.mxu0 %v511_v30  ;;  %949 = vmatpush2.msra.mxu1 %v703_v31  ;;  %v645_v30 = vld [vmem:[#allocation8 + $0x790] sm:$0xff]  ;;  %v448_v31 = vld [vmem:[#allocation8 + $0x168] sm:$0xff] }
  0xc9   :  { %879 = vmatprep.subr.mxu0 %v506_v32  ;;  %950 = vmatprep.subr.mxu1 %v698_v33  ;;  %v640_v32 = vld [vmem:[#allocation8 + $0x768] sm:$0xff]  ;;  %v447_v33 = vld [vmem:[#allocation8 + $0x160] sm:$0xff] }
  0xca   :  { %880 = vmatpush2.msra.mxu0 %v505_v34  ;;  %951 = vmatpush2.msra.mxu1 %v697_v35  ;;  %v639_v34 = vld [vmem:[#allocation8 + $0x760] sm:$0xff]  ;;  %v442_v35 = vld [vmem:[#allocation8 + $0x138] sm:$0xff] }
  0xcb   :  { %881 = vmatprep.subr.mxu0 %v500_v36  ;;  %952 = vmatprep.subr.mxu1 %v692_v37  ;;  %v634_v36 = vld [vmem:[#allocation8 + $0x738] sm:$0xff]  ;;  %v441_v37 = vld [vmem:[#allocation8 + $0x130] sm:$0xff] }
  0xcc   :  { %882 = vmatpush2.msra.mxu0 %v499_v38  ;;  %953 = vmatpush2.msra.mxu1 %v691_v39  ;;  %v633_v38 = vld [vmem:[#allocation8 + $0x730] sm:$0xff]  ;;  %v436_v39 = vld [vmem:[#allocation8 + $0x108] sm:$0xff] }
  0xcd   :  { %961 = vmatprep.subr.mxu0 %v496_v40  ;;  %1032 = vmatprep.subr.mxu1 %v688_v41  ;;  %v628_v40 = vld [vmem:[#allocation8 + $0x708] sm:$0xff]  ;;  %v435_v41 = vld [vmem:[#allocation8 + $0x100] sm:$0xff] }
 0x14c   :  { %v323_v53 = vpop.f32.mrf.mxu0  ;;  %v394_v54 = vpop.f32.mrf.mxu1 }
 0x14d   :  { %v395_v55 = vadd.f32 %v394_v54, %v231_v49  ;;  %v324_v56 = vadd.f32 %v323_v53, %v223_v50  ;;  %v622_v49 = vld [vmem:[#allocation8 + $0x6d8] sm:$0xff]  ;;  %v429_v50 = vld [vmem:[#allocation8 + $0xd0] sm:$0xff]  ;;  %v616_v53 = vld [vmem:[#allocation8 + $0x6a8] sm:$0xff] }
 0x14e   :  { %v325_v57 = vpop.f32.mrf.mxu0  ;;  %v396_v58 = vpop.f32.mrf.mxu1  ;;  %v423_v54 = vld [vmem:[#allocation8 + $0xa0] sm:$0xff] }
 0x14f   :  { %v326_v59 = vadd.f32 %v325_v57, %v227_v51  ;;  %v397_v60 = vadd.f32 %v396_v58, %v235_v52  ;;  %v1968_v61 = vmax.f32 %v395_v55, 0.0  ;;  %v1974_v0 = vmax.f32 %v324_v56, 0.0  ;;  %v621_v51 = vld [vmem:[#allocation8 + $0x6d0] sm:$0xff]  ;;  %v424_v52 = vld [vmem:[#allocation8 + $0xa8] sm:$0xff]  ;;  %v615_v55 = vld [vmem:[#allocation8 + $0x6a0] sm:$0xff] }
 0x150   :  { %v418_v56 = vld [vmem:[#allocation8 + $0x78] sm:$0xff]  ;;  %v417_v58 = vld [vmem:[#allocation8 + $0x70] sm:$0xff] }
 0x151   :  { %v1970_v62 = vmax.f32 %v326_v59, 0.0  ;;  %v1972_v63 = vmax.f32 %v397_v60, 0.0  ;;  %v610_v57 = vld [vmem:[#allocation8 + $0x678] sm:$0xff]  ;;  %v609_v59 = vld [vmem:[#allocation8 + $0x670] sm:$0xff]  ;;  %v412_v60 = vld [vmem:[#allocation8 + $0x48] sm:$0xff] }
 0x153   :  { %883 = vmatprep.mubr.f32.mxu0 %v1970_v62  ;;  %954 = vmatprep.mubr.f32.mxu1 %v1972_v63 }
 0x154   :  { %884 = vmatmul.mubr.f32.vlgmr.msra.gmra.mxu0 %v1974_v0  ;;  %955 = vmatmul.mubr.f32.vlgmr.msra.gmra.mxu1 %v1968_v61 }
 0x155   :  { %962 = vmatpush1.msra.mxu0 %v495_v1  ;;  %1033 = vmatpush1.msra.mxu1 %v687_v2  ;;  %v604_v1 = vld [vmem:[#allocation8 + $0x648] sm:$0xff]  ;;  %v411_v2 = vld [vmem:[#allocation8 + $0x40] sm:$0xff] }
 0x156   :  { %963 = vmatprep.subr.mxu0 %v490_v3  ;;  %1025 = vmatprep.mubr.f32.mxu0 %v1970_v62  ;;  %v603_v3 = vld [vmem:[#allocation8 + $0x640] sm:$0xff] }
 0x157   :  { %1034 = vmatprep.subr.mxu1 %v682_v4  ;;  %1096 = vmatprep.mubr.f32.mxu1 %v1972_v63  ;;  %v406_v4 = vld [vmem:[#allocation8 + $0x18] sm:$0xff] }
 0x158   :  { %964 = vmatpush1.msra.mxu0 %v489_v5  ;;  %1035 = vmatpush1.msra.mxu1 %v681_v6  ;;  %v598_v5 = vld [vmem:[#allocation8 + $0x618] sm:$0xff]  ;;  %v405_v6 = vld [vmem:[#allocation8 + $0x10] sm:$0xff] }
 0x159   :  { %965 = vmatprep.subr.mxu0 %v484_v7  ;;  %1036 = vmatprep.subr.mxu1 %v676_v8  ;;  %v597_v7 = vld [vmem:[#allocation8 + $0x610] sm:$0xff]  ;;  %v592_v8 = vld [vmem:[#allocation8 + $0x5e8] sm:$0xff] }
 0x15a   :  { %966 = vmatpush1.msra.mxu0 %v483_v9  ;;  %1037 = vmatpush1.msra.mxu1 %v675_v10  ;;  %v784_v9 = vld [vmem:[#allocation8 + $0xbe8] sm:$0xff]  ;;  %v591_v10 = vld [vmem:[#allocation8 + $0x5e0] sm:$0xff] }
 0x15b   :  { %967 = vmatprep.subr.mxu0 %v478_v11  ;;  %1038 = vmatprep.subr.mxu1 %v670_v12  ;;  %v783_v11 = vld [vmem:[#allocation8 + $0xbe0] sm:$0xff]  ;;  %v586_v12 = vld [vmem:[#allocation8 + $0x5b8] sm:$0xff] }
 0x15c   :  { %968 = vmatpush1.msra.mxu0 %v477_v13  ;;  %1039 = vmatpush1.msra.mxu1 %v669_v14  ;;  %v778_v13 = vld [vmem:[#allocation8 + $0xbb8] sm:$0xff]  ;;  %v585_v14 = vld [vmem:[#allocation8 + $0x5b0] sm:$0xff] }
 0x15d   :  { %969 = vmatprep.subr.mxu0 %v472_v15  ;;  %1040 = vmatprep.subr.mxu1 %v664_v16  ;;  %v777_v15 = vld [vmem:[#allocation8 + $0xbb0] sm:$0xff]  ;;  %v580_v16 = vld [vmem:[#allocation8 + $0x588] sm:$0xff] }
 0x15e   :  { %970 = vmatpush1.msra.mxu0 %v471_v17  ;;  %1041 = vmatpush1.msra.mxu1 %v663_v18  ;;  %v772_v17 = vld [vmem:[#allocation8 + $0xb88] sm:$0xff]  ;;  %v579_v18 = vld [vmem:[#allocation8 + $0x580] sm:$0xff] }
 0x15f   :  { %971 = vmatprep.subr.mxu0 %v466_v19  ;;  %1042 = vmatprep.subr.mxu1 %v658_v20  ;;  %v771_v19 = vld [vmem:[#allocation8 + $0xb80] sm:$0xff]  ;;  %v574_v20 = vld [vmem:[#allocation8 + $0x558] sm:$0xff] }
 0x160   :  { %972 = vmatpush1.msra.mxu0 %v465_v21  ;;  %1043 = vmatpush1.msra.mxu1 %v657_v22  ;;  %v766_v21 = vld [vmem:[#allocation8 + $0xb58] sm:$0xff]  ;;  %v573_v22 = vld [vmem:[#allocation8 + $0x550] sm:$0xff] }
 0x161   :  { %973 = vmatprep.subr.mxu0 %v460_v23  ;;  %1044 = vmatprep.subr.mxu1 %v652_v24  ;;  %v765_v23 = vld [vmem:[#allocation8 + $0xb50] sm:$0xff]  ;;  %v568_v24 = vld [vmem:[#allocation8 + $0x528] sm:$0xff] }
 0x162   :  { %974 = vmatpush1.msra.mxu0 %v459_v25  ;;  %1045 = vmatpush1.msra.mxu1 %v651_v26  ;;  %v760_v25 = vld [vmem:[#allocation8 + $0xb28] sm:$0xff]  ;;  %v567_v26 = vld [vmem:[#allocation8 + $0x520] sm:$0xff] }
 0x163   :  { %975 = vmatprep.subr.mxu0 %v454_v27  ;;  %1046 = vmatprep.subr.mxu1 %v646_v28  ;;  %v759_v27 = vld [vmem:[#allocation8 + $0xb20] sm:$0xff]  ;;  %v562_v28 = vld [vmem:[#allocation8 + $0x4f8] sm:$0xff] }
 0x164   :  { %976 = vmatpush1.msra.mxu0 %v453_v29  ;;  %1047 = vmatpush1.msra.mxu1 %v645_v30  ;;  %v754_v29 = vld [vmem:[#allocation8 + $0xaf8] sm:$0xff]  ;;  %v561_v30 = vld [vmem:[#allocation8 + $0x4f0] sm:$0xff] }
 0x165   :  { %977 = vmatprep.subr.mxu0 %v448_v31  ;;  %1048 = vmatprep.subr.mxu1 %v640_v32  ;;  %v753_v31 = vld [vmem:[#allocation8 + $0xaf0] sm:$0xff]  ;;  %v556_v32 = vld [vmem:[#allocation8 + $0x4c8] sm:$0xff] }
 0x166   :  { %978 = vmatpush1.msra.mxu0 %v447_v33  ;;  %1049 = vmatpush1.msra.mxu1 %v639_v34  ;;  %v748_v33 = vld [vmem:[#allocation8 + $0xac8] sm:$0xff]  ;;  %v555_v34 = vld [vmem:[#allocation8 + $0x4c0] sm:$0xff] }
 0x167   :  { %979 = vmatprep.subr.mxu0 %v442_v35  ;;  %1050 = vmatprep.subr.mxu1 %v634_v36  ;;  %v747_v35 = vld [vmem:[#allocation8 + $0xac0] sm:$0xff]  ;;  %v550_v36 = vld [vmem:[#allocation8 + $0x498] sm:$0xff] }
 0x168   :  { %980 = vmatpush1.msra.mxu0 %v441_v37  ;;  %1051 = vmatpush1.msra.mxu1 %v633_v38  ;;  %v742_v37 = vld [vmem:[#allocation8 + $0xa98] sm:$0xff]  ;;  %v549_v38 = vld [vmem:[#allocation8 + $0x490] sm:$0xff] }
 0x169   :  { %981 = vmatprep.subr.mxu0 %v436_v39  ;;  %1052 = vmatprep.subr.mxu1 %v628_v40  ;;  %v741_v39 = vld [vmem:[#allocation8 + $0xa90] sm:$0xff]  ;;  %v544_v40 = vld [vmem:[#allocation8 + $0x468] sm:$0xff] }
 0x16a   :  { %982 = vmatpush1.msra.mxu0 %v435_v41  ;;  %1053 = vmatpush1.msra.mxu1 %v627_v42  ;;  %v736_v41 = vld [vmem:[#allocation8 + $0xa68] sm:$0xff]  ;;  %v543_v42 = vld [vmem:[#allocation8 + $0x460] sm:$0xff] }
 0x16b   :  { %983 = vmatprep.subr.mxu0 %v430_v46  ;;  %1054 = vmatprep.subr.mxu1 %v622_v49  ;;  %v735_v46 = vld [vmem:[#allocation8 + $0xa60] sm:$0xff]  ;;  %v538_v49 = vld [vmem:[#allocation8 + $0x438] sm:$0xff] }
 0x16c   :  { %984 = vmatpush1.msra.mxu0 %v429_v50  ;;  %1055 = vmatpush1.msra.mxu1 %v621_v51  ;;  %v730_v50 = vld [vmem:[#allocation8 + $0xa38] sm:$0xff]  ;;  %v537_v51 = vld [vmem:[#allocation8 + $0x430] sm:$0xff] }
 0x16d   :  { %985 = vmatprep.subr.mxu0 %v424_v52  ;;  %1056 = vmatprep.subr.mxu1 %v616_v53  ;;  %v729_v52 = vld [vmem:[#allocation8 + $0xa30] sm:$0xff]  ;;  %v532_v53 = vld [vmem:[#allocation8 + $0x408] sm:$0xff] }
 0x16e   :  { %986 = vmatpush1.msra.mxu0 %v423_v54  ;;  %1057 = vmatpush1.msra.mxu1 %v615_v55  ;;  %v724_v54 = vld [vmem:[#allocation8 + $0xa08] sm:$0xff]  ;;  %v531_v55 = vld [vmem:[#allocation8 + $0x400] sm:$0xff] }
 0x16f   :  { %987 = vmatprep.subr.mxu0 %v418_v56  ;;  %1058 = vmatprep.subr.mxu1 %v610_v57  ;;  %v723_v56 = vld [vmem:[#allocation8 + $0xa00] sm:$0xff]  ;;  %v526_v57 = vld [vmem:[#allocation8 + $0x3d8] sm:$0xff] }
 0x170   :  { %988 = vmatpush1.msra.mxu0 %v417_v58  ;;  %1059 = vmatpush1.msra.mxu1 %v609_v59  ;;  %v718_v58 = vld [vmem:[#allocation8 + $0x9d8] sm:$0xff]  ;;  %v525_v59 = vld [vmem:[#allocation8 + $0x3d0] sm:$0xff] }
 0x171   :  { %989 = vmatprep.subr.mxu0 %v412_v60  ;;  %1060 = vmatprep.subr.mxu1 %v604_v1  ;;  %v717_v60 = vld [vmem:[#allocation8 + $0x9d0] sm:$0xff]  ;;  %v520_v1 = vld [vmem:[#allocation8 + $0x3a8] sm:$0xff] }
 0x172   :  { %990 = vmatpush1.msra.mxu0 %v411_v2  ;;  %1061 = vmatpush1.msra.mxu1 %v603_v3  ;;  %v712_v2 = vld [vmem:[#allocation8 + $0x9a8] sm:$0xff]  ;;  %v519_v3 = vld [vmem:[#allocation8 + $0x3a0] sm:$0xff] }
 0x173   :  { %991 = vmatprep.subr.mxu0 %v406_v4  ;;  %1062 = vmatprep.subr.mxu1 %v598_v5  ;;  %v711_v4 = vld [vmem:[#allocation8 + $0x9a0] sm:$0xff]  ;;  %v514_v5 = vld [vmem:[#allocation8 + $0x378] sm:$0xff] }
 0x174   :  { %992 = vmatpush1.msra.mxu0 %v405_v6  ;;  %1063 = vmatpush1.msra.mxu1 %v597_v7  ;;  %v706_v6 = vld [vmem:[#allocation8 + $0x978] sm:$0xff]  ;;  %v513_v7 = vld [vmem:[#allocation8 + $0x370] sm:$0xff] }
 0x175   :  { %993 = vmatprep.subr.mxu0 %v592_v8  ;;  %1064 = vmatprep.subr.mxu1 %v784_v9  ;;  %v705_v8 = vld [vmem:[#allocation8 + $0x970] sm:$0xff]  ;;  %v508_v9 = vld [vmem:[#allocation8 + $0x348] sm:$0xff] }
 0x176   :  { %994 = vmatpush2.msra.mxu0 %v591_v10  ;;  %1065 = vmatpush2.msra.mxu1 %v783_v11  ;;  %v700_v10 = vld [vmem:[#allocation8 + $0x948] sm:$0xff]  ;;  %v507_v11 = vld [vmem:[#allocation8 + $0x340] sm:$0xff] }
 0x177   :  { %995 = vmatprep.subr.mxu0 %v586_v12  ;;  %1066 = vmatprep.subr.mxu1 %v778_v13  ;;  %v699_v12 = vld [vmem:[#allocation8 + $0x940] sm:$0xff]  ;;  %v502_v13 = vld [vmem:[#allocation8 + $0x318] sm:$0xff] }
 0x178   :  { %996 = vmatpush2.msra.mxu0 %v585_v14  ;;  %1067 = vmatpush2.msra.mxu1 %v777_v15  ;;  %v694_v14 = vld [vmem:[#allocation8 + $0x918] sm:$0xff]  ;;  %v501_v15 = vld [vmem:[#allocation8 + $0x310] sm:$0xff] }
 0x179   :  { %997 = vmatprep.subr.mxu0 %v580_v16  ;;  %1068 = vmatprep.subr.mxu1 %v772_v17  ;;  %v693_v16 = vld [vmem:[#allocation8 + $0x910] sm:$0xff]  ;;  %v498_v17 = vld [vmem:[#allocation8 + $0x2f8] sm:$0xff] }
 0x17a   :  { %998 = vmatpush2.msra.mxu0 %v579_v18  ;;  %1069 = vmatpush2.msra.mxu1 %v771_v19  ;;  %v690_v18 = vld [vmem:[#allocation8 + $0x8f8] sm:$0xff]  ;;  %v497_v19 = vld [vmem:[#allocation8 + $0x2f0] sm:$0xff] }
 0x17b   :  { %999 = vmatprep.subr.mxu0 %v574_v20  ;;  %1070 = vmatprep.subr.mxu1 %v766_v21  ;;  %v689_v20 = vld [vmem:[#allocation8 + $0x8f0] sm:$0xff]  ;;  %v492_v21 = vld [vmem:[#allocation8 + $0x2c8] sm:$0xff] }
 0x17c   :  { %1000 = vmatpush2.msra.mxu0 %v573_v22  ;;  %1071 = vmatpush2.msra.mxu1 %v765_v23  ;;  %v684_v22 = vld [vmem:[#allocation8 + $0x8c8] sm:$0xff]  ;;  %v491_v23 = vld [vmem:[#allocation8 + $0x2c0] sm:$0xff] }
 0x17d   :  { %1001 = vmatprep.subr.mxu0 %v568_v24  ;;  %1072 = vmatprep.subr.mxu1 %v760_v25  ;;  %v683_v24 = vld [vmem:[#allocation8 + $0x8c0] sm:$0xff]  ;;  %v486_v25 = vld [vmem:[#allocation8 + $0x298] sm:$0xff] }
 0x17e   :  { %1002 = vmatpush2.msra.mxu0 %v567_v26  ;;  %1073 = vmatpush2.msra.mxu1 %v759_v27  ;;  %v678_v26 = vld [vmem:[#allocation8 + $0x898] sm:$0xff]  ;;  %v485_v27 = vld [vmem:[#allocation8 + $0x290] sm:$0xff] }
 0x17f   :  { %1003 = vmatprep.subr.mxu0 %v562_v28  ;;  %1074 = vmatprep.subr.mxu1 %v754_v29  ;;  %v677_v28 = vld [vmem:[#allocation8 + $0x890] sm:$0xff]  ;;  %v480_v29 = vld [vmem:[#allocation8 + $0x268] sm:$0xff] }
 0x180   :  { %1004 = vmatpush2.msra.mxu0 %v561_v30  ;;  %1075 = vmatpush2.msra.mxu1 %v753_v31  ;;  %v672_v30 = vld [vmem:[#allocation8 + $0x868] sm:$0xff]  ;;  %v479_v31 = vld [vmem:[#allocation8 + $0x260] sm:$0xff] }
 0x181   :  { %1005 = vmatprep.subr.mxu0 %v556_v32  ;;  %1076 = vmatprep.subr.mxu1 %v748_v33  ;;  %v671_v32 = vld [vmem:[#allocation8 + $0x860] sm:$0xff]  ;;  %v666_v33 = vld [vmem:[#allocation8 + $0x838] sm:$0xff] }
 0x182   :  { %1006 = vmatpush2.msra.mxu0 %v555_v34  ;;  %1077 = vmatpush2.msra.mxu1 %v747_v35  ;;  %v665_v34 = vld [vmem:[#allocation8 + $0x830] sm:$0xff]  ;;  %v468_v35 = vld [vmem:[#allocation8 + $0x208] sm:$0xff] }
 0x183   :  { %1007 = vmatprep.subr.mxu0 %v550_v36  ;;  %1078 = vmatprep.subr.mxu1 %v742_v37  ;;  %v660_v36 = vld [vmem:[#allocation8 + $0x808] sm:$0xff]  ;;  %v467_v37 = vld [vmem:[#allocation8 + $0x200] sm:$0xff] }
 0x184   :  { %1008 = vmatpush2.msra.mxu0 %v549_v38  ;;  %1079 = vmatpush2.msra.mxu1 %v741_v39  ;;  %v659_v38 = vld [vmem:[#allocation8 + $0x800] sm:$0xff]  ;;  %v462_v39 = vld [vmem:[#allocation8 + $0x1d8] sm:$0xff] }
 0x185   :  { %1009 = vmatprep.subr.mxu0 %v544_v40  ;;  %1080 = vmatprep.subr.mxu1 %v736_v41  ;;  %v654_v40 = vld [vmem:[#allocation8 + $0x7d8] sm:$0xff]  ;;  %v461_v41 = vld [vmem:[#allocation8 + $0x1d0] sm:$0xff] }
 0x186   :  { %1010 = vmatpush2.msra.mxu0 %v543_v42  ;;  %1081 = vmatpush2.msra.mxu1 %v735_v46  ;;  %v653_v42 = vld [vmem:[#allocation8 + $0x7d0] sm:$0xff]  ;;  %v456_v46 = vld [vmem:[#allocation8 + $0x1a8] sm:$0xff] }
 0x187   :  { %1011 = vmatprep.subr.mxu0 %v538_v49  ;;  %1082 = vmatprep.subr.mxu1 %v730_v50  ;;  %v648_v49 = vld [vmem:[#allocation8 + $0x7a8] sm:$0xff]  ;;  %v455_v50 = vld [vmem:[#allocation8 + $0x1a0] sm:$0xff] }
 0x188   :  { %1012 = vmatpush2.msra.mxu0 %v537_v51  ;;  %1083 = vmatpush2.msra.mxu1 %v729_v52  ;;  %v647_v51 = vld [vmem:[#allocation8 + $0x7a0] sm:$0xff]  ;;  %v450_v52 = vld [vmem:[#allocation8 + $0x178] sm:$0xff] }
 0x189   :  { %1013 = vmatprep.subr.mxu0 %v532_v53  ;;  %1084 = vmatprep.subr.mxu1 %v724_v54  ;;  %v642_v53 = vld [vmem:[#allocation8 + $0x778] sm:$0xff]  ;;  %v449_v54 = vld [vmem:[#allocation8 + $0x170] sm:$0xff] }
 0x18a   :  { %1014 = vmatpush2.msra.mxu0 %v531_v55  ;;  %1085 = vmatpush2.msra.mxu1 %v723_v56  ;;  %v641_v55 = vld [vmem:[#allocation8 + $0x770] sm:$0xff]  ;;  %v444_v56 = vld [vmem:[#allocation8 + $0x148] sm:$0xff] }
 0x18b   :  { %1015 = vmatprep.subr.mxu0 %v526_v57  ;;  %1086 = vmatprep.subr.mxu1 %v718_v58  ;;  %v636_v57 = vld [vmem:[#allocation8 + $0x748] sm:$0xff]  ;;  %v443_v58 = vld [vmem:[#allocation8 + $0x140] sm:$0xff] }
 0x18c   :  { %1016 = vmatpush2.msra.mxu0 %v525_v59  ;;  %1087 = vmatpush2.msra.mxu1 %v717_v60  ;;  %v635_v59 = vld [vmem:[#allocation8 + $0x740] sm:$0xff]  ;;  %v438_v60 = vld [vmem:[#allocation8 + $0x118] sm:$0xff] }
 0x18d   :  { %1017 = vmatprep.subr.mxu0 %v520_v1  ;;  %1088 = vmatprep.subr.mxu1 %v712_v2  ;;  %v630_v1 = vld [vmem:[#allocation8 + $0x718] sm:$0xff]  ;;  %v437_v2 = vld [vmem:[#allocation8 + $0x110] sm:$0xff] }
 0x18e   :  { %1018 = vmatpush2.msra.mxu0 %v519_v3  ;;  %1089 = vmatpush2.msra.mxu1 %v711_v4  ;;  %v629_v3 = vld [vmem:[#allocation8 + $0x710] sm:$0xff]  ;;  %v432_v4 = vld [vmem:[#allocation8 + $0xe8] sm:$0xff] }
 0x18f   :  { %1019 = vmatprep.subr.mxu0 %v514_v5  ;;  %1090 = vmatprep.subr.mxu1 %v706_v6  ;;  %v624_v5 = vld [vmem:[#allocation8 + $0x6e8] sm:$0xff]  ;;  %v431_v6 = vld [vmem:[#allocation8 + $0xe0] sm:$0xff] }
 0x190   :  { %1020 = vmatpush2.msra.mxu0 %v513_v7  ;;  %1091 = vmatpush2.msra.mxu1 %v705_v8  ;;  %v623_v7 = vld [vmem:[#allocation8 + $0x6e0] sm:$0xff]  ;;  %v426_v8 = vld [vmem:[#allocation8 + $0xb8] sm:$0xff] }
 0x191   :  { %1021 = vmatprep.subr.mxu0 %v508_v9  ;;  %1092 = vmatprep.subr.mxu1 %v700_v10  ;;  %v618_v9 = vld [vmem:[#allocation8 + $0x6b8] sm:$0xff]  ;;  %v425_v10 = vld [vmem:[#allocation8 + $0xb0] sm:$0xff] }
 0x192   :  { %1022 = vmatpush2.msra.mxu0 %v507_v11  ;;  %1093 = vmatpush2.msra.mxu1 %v699_v12  ;;  %v617_v11 = vld [vmem:[#allocation8 + $0x6b0] sm:$0xff]  ;;  %v420_v12 = vld [vmem:[#allocation8 + $0x88] sm:$0xff] }
 0x193   :  { %1023 = vmatprep.subr.mxu0 %v502_v13  ;;  %1094 = vmatprep.subr.mxu1 %v694_v14  ;;  %v612_v13 = vld [vmem:[#allocation8 + $0x688] sm:$0xff]  ;;  %v419_v14 = vld [vmem:[#allocation8 + $0x80] sm:$0xff] }
 0x194   :  { %1024 = vmatpush2.msra.mxu0 %v501_v15  ;;  %1095 = vmatpush2.msra.mxu1 %v693_v16  ;;  %v611_v15 = vld [vmem:[#allocation8 + $0x680] sm:$0xff]  ;;  %v414_v16 = vld [vmem:[#allocation8 + $0x58] sm:$0xff] }
 0x195   :  { %1026 = vmatmul.mubr.f32.vlgmr.msra.gmra.mxu0 %v1974_v0  ;;  %1097 = vmatmul.mubr.f32.vlgmr.msra.gmra.mxu1 %v1968_v61 }
 0x196   :  { %1103 = vmatprep.subr.mxu0 %v498_v17  ;;  %1174 = vmatprep.subr.mxu1 %v690_v18  ;;  %v606_v17 = vld [vmem:[#allocation8 + $0x658] sm:$0xff]  ;;  %v413_v18 = vld [vmem:[#allocation8 + $0x50] sm:$0xff] }
 0x197   :  { %1104 = vmatpush1.msra.mxu0 %v497_v19  ;;  %1167 = vmatprep.mubr.f32.mxu0 %v1970_v62  ;;  %v474_v62 = vld [vmem:[#allocation8 + $0x238] sm:$0xff]  ;;  %v605_v19 = vld [vmem:[#allocation8 + $0x650] sm:$0xff] }
 0x198   :  { %1175 = vmatpush1.msra.mxu1 %v689_v20  ;;  %1238 = vmatprep.mubr.f32.mxu1 %v1972_v63  ;;  %v473_v63 = vld [vmem:[#allocation8 + $0x230] sm:$0xff]  ;;  %v408_v20 = vld [vmem:[#allocation8 + $0x28] sm:$0xff] }
 0x199   :  { %1105 = vmatprep.subr.mxu0 %v492_v21  ;;  %1176 = vmatprep.subr.mxu1 %v684_v22  ;;  %v600_v21 = vld [vmem:[#allocation8 + $0x628] sm:$0xff]  ;;  %v407_v22 = vld [vmem:[#allocation8 + $0x20] sm:$0xff] }
 0x19a   :  { %1106 = vmatpush1.msra.mxu0 %v491_v23  ;;  %1177 = vmatpush1.msra.mxu1 %v683_v24  ;;  %v599_v23 = vld [vmem:[#allocation8 + $0x620] sm:$0xff]  ;;  %v594_v24 = vld [vmem:[#allocation8 + $0x5f8] sm:$0xff] }
 0x19b   :  { %1107 = vmatprep.subr.mxu0 %v486_v25  ;;  %1178 = vmatprep.subr.mxu1 %v678_v26  ;;  %v786_v25 = vld [vmem:[#allocation8 + $0xbf8] sm:$0xff]  ;;  %v593_v26 = vld [vmem:[#allocation8 + $0x5f0] sm:$0xff] }
 0x19c   :  { %1108 = vmatpush1.msra.mxu0 %v485_v27  ;;  %1179 = vmatpush1.msra.mxu1 %v677_v28  ;;  %v785_v27 = vld [vmem:[#allocation8 + $0xbf0] sm:$0xff]  ;;  %v588_v28 = vld [vmem:[#allocation8 + $0x5c8] sm:$0xff] }
 0x19d   :  { %1109 = vmatprep.subr.mxu0 %v480_v29  ;;  %1180 = vmatprep.subr.mxu1 %v672_v30  ;;  %v780_v29 = vld [vmem:[#allocation8 + $0xbc8] sm:$0xff]  ;;  %v587_v30 = vld [vmem:[#allocation8 + $0x5c0] sm:$0xff] }
 0x19e   :  { %1110 = vmatpush1.msra.mxu0 %v479_v31  ;;  %1181 = vmatpush1.msra.mxu1 %v671_v32  ;;  %v779_v31 = vld [vmem:[#allocation8 + $0xbc0] sm:$0xff]  ;;  %v582_v32 = vld [vmem:[#allocation8 + $0x598] sm:$0xff] }
 0x19f   :  { %1111 = vmatprep.subr.mxu0 %v474_v62  ;;  %1182 = vmatprep.subr.mxu1 %v666_v33  ;;  %v774_v62 = vld [vmem:[#allocation8 + $0xb98] sm:$0xff]  ;;  %v581_v33 = vld [vmem:[#allocation8 + $0x590] sm:$0xff] }
 0x1a0   :  { %1112 = vmatpush1.msra.mxu0 %v473_v63  ;;  %1183 = vmatpush1.msra.mxu1 %v665_v34  ;;  %v773_v63 = vld [vmem:[#allocation8 + $0xb90] sm:$0xff]  ;;  %v576_v34 = vld [vmem:[#allocation8 + $0x568] sm:$0xff] }
 0x1a1   :  { %1113 = vmatprep.subr.mxu0 %v468_v35  ;;  %1184 = vmatprep.subr.mxu1 %v660_v36  ;;  %v768_v35 = vld [vmem:[#allocation8 + $0xb68] sm:$0xff]  ;;  %v575_v36 = vld [vmem:[#allocation8 + $0x560] sm:$0xff] }
 0x1a2   :  { %1114 = vmatpush1.msra.mxu0 %v467_v37  ;;  %1185 = vmatpush1.msra.mxu1 %v659_v38  ;;  %v767_v37 = vld [vmem:[#allocation8 + $0xb60] sm:$0xff]  ;;  %v570_v38 = vld [vmem:[#allocation8 + $0x538] sm:$0xff] }
 0x1a3   :  { %1115 = vmatprep.subr.mxu0 %v462_v39  ;;  %1186 = vmatprep.subr.mxu1 %v654_v40  ;;  %v762_v39 = vld [vmem:[#allocation8 + $0xb38] sm:$0xff]  ;;  %v569_v40 = vld [vmem:[#allocation8 + $0x530] sm:$0xff] }
 0x1a4   :  { %1116 = vmatpush1.msra.mxu0 %v461_v41  ;;  %1187 = vmatpush1.msra.mxu1 %v653_v42  ;;  %v761_v41 = vld [vmem:[#allocation8 + $0xb30] sm:$0xff]  ;;  %v564_v42 = vld [vmem:[#allocation8 + $0x508] sm:$0xff] }
 0x1a5   :  { %1117 = vmatprep.subr.mxu0 %v456_v46  ;;  %1188 = vmatprep.subr.mxu1 %v648_v49  ;;  %v756_v46 = vld [vmem:[#allocation8 + $0xb08] sm:$0xff]  ;;  %v563_v49 = vld [vmem:[#allocation8 + $0x500] sm:$0xff] }
 0x1a6   :  { %1118 = vmatpush1.msra.mxu0 %v455_v50  ;;  %1189 = vmatpush1.msra.mxu1 %v647_v51  ;;  %v755_v50 = vld [vmem:[#allocation8 + $0xb00] sm:$0xff]  ;;  %v558_v51 = vld [vmem:[#allocation8 + $0x4d8] sm:$0xff] }
 0x1a7   :  { %1119 = vmatprep.subr.mxu0 %v450_v52  ;;  %1190 = vmatprep.subr.mxu1 %v642_v53  ;;  %v750_v52 = vld [vmem:[#allocation8 + $0xad8] sm:$0xff]  ;;  %v557_v53 = vld [vmem:[#allocation8 + $0x4d0] sm:$0xff] }
 0x1a8   :  { %1120 = vmatpush1.msra.mxu0 %v449_v54  ;;  %1191 = vmatpush1.msra.mxu1 %v641_v55  ;;  %v749_v54 = vld [vmem:[#allocation8 + $0xad0] sm:$0xff]  ;;  %v552_v55 = vld [vmem:[#allocation8 + $0x4a8] sm:$0xff] }
 0x1a9   :  { %1121 = vmatprep.subr.mxu0 %v444_v56  ;;  %1192 = vmatprep.subr.mxu1 %v636_v57  ;;  %v744_v56 = vld [vmem:[#allocation8 + $0xaa8] sm:$0xff]  ;;  %v551_v57 = vld [vmem:[#allocation8 + $0x4a0] sm:$0xff] }
 0x1aa   :  { %1122 = vmatpush1.msra.mxu0 %v443_v58  ;;  %1193 = vmatpush1.msra.mxu1 %v635_v59  ;;  %v743_v58 = vld [vmem:[#allocation8 + $0xaa0] sm:$0xff]  ;;  %v546_v59 = vld [vmem:[#allocation8 + $0x478] sm:$0xff] }
 0x1ab   :  { %1123 = vmatprep.subr.mxu0 %v438_v60  ;;  %1194 = vmatprep.subr.mxu1 %v630_v1  ;;  %v738_v60 = vld [vmem:[#allocation8 + $0xa78] sm:$0xff]  ;;  %v545_v1 = vld [vmem:[#allocation8 + $0x470] sm:$0xff] }
 0x1ac   :  { %1124 = vmatpush1.msra.mxu0 %v437_v2  ;;  %1195 = vmatpush1.msra.mxu1 %v629_v3  ;;  %v737_v2 = vld [vmem:[#allocation8 + $0xa70] sm:$0xff]  ;;  %v540_v3 = vld [vmem:[#allocation8 + $0x448] sm:$0xff] }
 0x1ad   :  { %1125 = vmatprep.subr.mxu0 %v432_v4  ;;  %1196 = vmatprep.subr.mxu1 %v624_v5  ;;  %v732_v4 = vld [vmem:[#allocation8 + $0xa48] sm:$0xff]  ;;  %v539_v5 = vld [vmem:[#allocation8 + $0x440] sm:$0xff] }
 0x1ae   :  { %1126 = vmatpush1.msra.mxu0 %v431_v6  ;;  %1197 = vmatpush1.msra.mxu1 %v623_v7  ;;  %v731_v6 = vld [vmem:[#allocation8 + $0xa40] sm:$0xff]  ;;  %v534_v7 = vld [vmem:[#allocation8 + $0x418] sm:$0xff] }
 0x1af   :  { %1127 = vmatprep.subr.mxu0 %v426_v8  ;;  %1198 = vmatprep.subr.mxu1 %v618_v9  ;;  %v726_v8 = vld [vmem:[#allocation8 + $0xa18] sm:$0xff]  ;;  %v533_v9 = vld [vmem:[#allocation8 + $0x410] sm:$0xff] }
 0x1b0   :  { %1128 = vmatpush1.msra.mxu0 %v425_v10  ;;  %1199 = vmatpush1.msra.mxu1 %v617_v11  ;;  %v725_v10 = vld [vmem:[#allocation8 + $0xa10] sm:$0xff]  ;;  %v528_v11 = vld [vmem:[#allocation8 + $0x3e8] sm:$0xff] }
 0x1b1   :  { %1129 = vmatprep.subr.mxu0 %v420_v12  ;;  %1200 = vmatprep.subr.mxu1 %v612_v13  ;;  %v720_v12 = vld [vmem:[#allocation8 + $0x9e8] sm:$0xff]  ;;  %v527_v13 = vld [vmem:[#allocation8 + $0x3e0] sm:$0xff] }
 0x1b2   :  { %1130 = vmatpush1.msra.mxu0 %v419_v14  ;;  %1201 = vmatpush1.msra.mxu1 %v611_v15  ;;  %v719_v14 = vld [vmem:[#allocation8 + $0x9e0] sm:$0xff]  ;;  %v522_v15 = vld [vmem:[#allocation8 + $0x3b8] sm:$0xff] }
 0x1b3   :  { %1131 = vmatprep.subr.mxu0 %v414_v16  ;;  %1202 = vmatprep.subr.mxu1 %v606_v17  ;;  %v714_v16 = vld [vmem:[#allocation8 + $0x9b8] sm:$0xff]  ;;  %v521_v17 = vld [vmem:[#allocation8 + $0x3b0] sm:$0xff] }
 0x1b4   :  { %1132 = vmatpush1.msra.mxu0 %v413_v18  ;;  %1203 = vmatpush1.msra.mxu1 %v605_v19  ;;  %v713_v18 = vld [vmem:[#allocation8 + $0x9b0] sm:$0xff]  ;;  %v516_v19 = vld [vmem:[#allocation8 + $0x388] sm:$0xff] }
 0x1b5   :  { %1133 = vmatprep.subr.mxu0 %v408_v20  ;;  %1204 = vmatprep.subr.mxu1 %v600_v21  ;;  %v708_v20 = vld [vmem:[#allocation8 + $0x988] sm:$0xff]  ;;  %v515_v21 = vld [vmem:[#allocation8 + $0x380] sm:$0xff] }
 0x1b6   :  { %1134 = vmatpush1.msra.mxu0 %v407_v22  ;;  %1205 = vmatpush1.msra.mxu1 %v599_v23  ;;  %v707_v22 = vld [vmem:[#allocation8 + $0x980] sm:$0xff]  ;;  %v510_v23 = vld [vmem:[#allocation8 + $0x358] sm:$0xff] }
 0x1b7   :  { %1135 = vmatprep.subr.mxu0 %v594_v24  ;;  %1206 = vmatprep.subr.mxu1 %v786_v25  ;;  %v702_v24 = vld [vmem:[#allocation8 + $0x958] sm:$0xff]  ;;  %v509_v25 = vld [vmem:[#allocation8 + $0x350] sm:$0xff] }
 0x1b8   :  { %1136 = vmatpush2.msra.mxu0 %v593_v26  ;;  %1207 = vmatpush2.msra.mxu1 %v785_v27  ;;  %v701_v26 = vld [vmem:[#allocation8 + $0x950] sm:$0xff]  ;;  %v504_v27 = vld [vmem:[#allocation8 + $0x328] sm:$0xff] }
 0x1b9   :  { %1137 = vmatprep.subr.mxu0 %v588_v28  ;;  %1208 = vmatprep.subr.mxu1 %v780_v29  ;;  %v696_v28 = vld [vmem:[#allocation8 + $0x928] sm:$0xff]  ;;  %v503_v29 = vld [vmem:[#allocation8 + $0x320] sm:$0xff] }
 0x1ba   :  { %1138 = vmatpush2.msra.mxu0 %v587_v30  ;;  %1209 = vmatpush2.msra.mxu1 %v779_v31  ;;  %v695_v30 = vld [vmem:[#allocation8 + $0x920] sm:$0xff] }
 0x1bb   :  { %1139 = vmatprep.subr.mxu0 %v582_v32  ;;  %1210 = vmatprep.subr.mxu1 %v774_v62  ;;  %v1282_v31 = vld [vmem:[#allocation11 + $0xf8] sm:$0xff] }
 0x1bc   :  { %1140 = vmatpush2.msra.mxu0 %v581_v33  ;;  %1211 = vmatpush2.msra.mxu1 %v773_v63  ;;  %v1314_v32 = vld [vmem:[#allocation11 + $0x1f8] sm:$0xff]  ;;  %v1281_v63 = vld [vmem:[#allocation11 + $0xf0] sm:$0xff] }
 0x1bd   :  { %1141 = vmatprep.subr.mxu0 %v576_v34  ;;  %1212 = vmatprep.subr.mxu1 %v768_v35  ;;  %v1266_v62 = vld [vmem:[#allocation11 + $0x78] sm:$0xff]  ;;  %v1313_v34 = vld [vmem:[#allocation11 + $0x1f0] sm:$0xff] }
 0x1be   :  { %1142 = vmatpush2.msra.mxu0 %v575_v36  ;;  %1213 = vmatpush2.msra.mxu1 %v767_v37  ;;  %v1298_v33 = vld [vmem:[#allocation11 + $0x178] sm:$0xff]  ;;  %v1265_v35 = vld [vmem:[#allocation11 + $0x70] sm:$0xff]  ;;  %v1280_v37 = vld [vmem:[#allocation11 + $0xe8] sm:$0xff] }
 0x1bf   :  { %1143 = vmatprep.subr.mxu0 %v570_v38  ;;  %1214 = vmatprep.subr.mxu1 %v762_v39  ;;  %v1297_v36 = vld [vmem:[#allocation11 + $0x170] sm:$0xff]  ;;  %v1312_v38 = vld [vmem:[#allocation11 + $0x1e8] sm:$0xff] }
 0x1c0   :  { %1144 = vmatpush2.msra.mxu0 %v569_v40  ;;  %1215 = vmatpush2.msra.mxu1 %v761_v41  ;;  %v1264_v39 = vld [vmem:[#allocation11 + $0x68] sm:$0xff]  ;;  %v1279_v41 = vld [vmem:[#allocation11 + $0xe0] sm:$0xff] }
 0x1c1   :  { %1145 = vmatprep.subr.mxu0 %v564_v42  ;;  %1216 = vmatprep.subr.mxu1 %v756_v46  ;;  %v1296_v40 = vld [vmem:[#allocation11 + $0x168] sm:$0xff]  ;;  %v1295_v42 = vld [vmem:[#allocation11 + $0x160] sm:$0xff]  ;;  %v1278_v46 = vld [vmem:[#allocation11 + $0xd8] sm:$0xff] }
 0x1c2   :  { %1146 = vmatpush2.msra.mxu0 %v563_v49  ;;  %1217 = vmatpush2.msra.mxu1 %v755_v50  ;;  %v1310_v49 = vld [vmem:[#allocation11 + $0x1d8] sm:$0xff] }
 0x1c3   :  { %1147 = vmatprep.subr.mxu0 %v558_v51  ;;  %1218 = vmatprep.subr.mxu1 %v750_v52  ;;  %v1262_v50 = vld [vmem:[#allocation11 + $0x58] sm:$0xff]  ;;  %v1277_v52 = vld [vmem:[#allocation11 + $0xd0] sm:$0xff] }
 0x1c4   :  { %1148 = vmatpush2.msra.mxu0 %v557_v53  ;;  %1219 = vmatpush2.msra.mxu1 %v749_v54  ;;  %v1294_v51 = vld [vmem:[#allocation11 + $0x158] sm:$0xff]  ;;  %v1309_v53 = vld [vmem:[#allocation11 + $0x1d0] sm:$0xff] }
 0x1c5   :  { %1149 = vmatprep.subr.mxu0 %v552_v55  ;;  %1220 = vmatprep.subr.mxu1 %v744_v56  ;;  %v1261_v54 = vld [vmem:[#allocation11 + $0x50] sm:$0xff]  ;;  %v1276_v56 = vld [vmem:[#allocation11 + $0xc8] sm:$0xff] }
 0x1c6   :  { %1150 = vmatpush2.msra.mxu0 %v551_v57  ;;  %1221 = vmatpush2.msra.mxu1 %v743_v58  ;;  %v1293_v55 = vld [vmem:[#allocation11 + $0x150] sm:$0xff]  ;;  %v1308_v57 = vld [vmem:[#allocation11 + $0x1c8] sm:$0xff] }
 0x1c7   :  { %1151 = vmatprep.subr.mxu0 %v546_v59  ;;  %1222 = vmatprep.subr.mxu1 %v738_v60  ;;  %v1260_v58 = vld [vmem:[#allocation11 + $0x48] sm:$0xff]  ;;  %v1275_v60 = vld [vmem:[#allocation11 + $0xc0] sm:$0xff] }
 0x1c8   :  { %1152 = vmatpush2.msra.mxu0 %v545_v1  ;;  %1223 = vmatpush2.msra.mxu1 %v737_v2  ;;  %v1292_v59 = vld [vmem:[#allocation11 + $0x148] sm:$0xff]  ;;  %v1307_v1 = vld [vmem:[#allocation11 + $0x1c0] sm:$0xff] }
 0x1c9   :  { %1153 = vmatprep.subr.mxu0 %v540_v3  ;;  %1224 = vmatprep.subr.mxu1 %v732_v4  ;;  %v1259_v2 = vld [vmem:[#allocation11 + $0x40] sm:$0xff]  ;;  %v1274_v4 = vld [vmem:[#allocation11 + $0xb8] sm:$0xff] }
 0x1ca   :  { %1154 = vmatpush2.msra.mxu0 %v539_v5  ;;  %1225 = vmatpush2.msra.mxu1 %v731_v6  ;;  %v1291_v3 = vld [vmem:[#allocation11 + $0x140] sm:$0xff]  ;;  %v1306_v5 = vld [vmem:[#allocation11 + $0x1b8] sm:$0xff] }
 0x1cb   :  { %1155 = vmatprep.subr.mxu0 %v534_v7  ;;  %1226 = vmatprep.subr.mxu1 %v726_v8  ;;  %v1258_v6 = vld [vmem:[#allocation11 + $0x38] sm:$0xff]  ;;  %v1273_v8 = vld [vmem:[#allocation11 + $0xb0] sm:$0xff] }
 0x1cc   :  { %1156 = vmatpush2.msra.mxu0 %v533_v9  ;;  %1227 = vmatpush2.msra.mxu1 %v725_v10  ;;  %v1290_v7 = vld [vmem:[#allocation11 + $0x138] sm:$0xff]  ;;  %v1305_v9 = vld [vmem:[#allocation11 + $0x1b0] sm:$0xff] }
 0x1cd   :  { %1157 = vmatprep.subr.mxu0 %v528_v11  ;;  %1228 = vmatprep.subr.mxu1 %v720_v12  ;;  %v1257_v10 = vld [vmem:[#allocation11 + $0x30] sm:$0xff]  ;;  %v1272_v12 = vld [vmem:[#allocation11 + $0xa8] sm:$0xff] }
 0x1ce   :  { %1158 = vmatpush2.msra.mxu0 %v527_v13  ;;  %1229 = vmatpush2.msra.mxu1 %v719_v14  ;;  %v1289_v11 = vld [vmem:[#allocation11 + $0x130] sm:$0xff]  ;;  %v1304_v13 = vld [vmem:[#allocation11 + $0x1a8] sm:$0xff] }
 0x1cf   :  { %1159 = vmatprep.subr.mxu0 %v522_v15  ;;  %1230 = vmatprep.subr.mxu1 %v714_v16  ;;  %v1256_v14 = vld [vmem:[#allocation11 + $0x28] sm:$0xff]  ;;  %v1271_v16 = vld [vmem:[#allocation11 + $0xa0] sm:$0xff] }
 0x1d0   :  { %1160 = vmatpush2.msra.mxu0 %v521_v17  ;;  %1231 = vmatpush2.msra.mxu1 %v713_v18  ;;  %v1288_v15 = vld [vmem:[#allocation11 + $0x128] sm:$0xff]  ;;  %v1303_v17 = vld [vmem:[#allocation11 + $0x1a0] sm:$0xff] }
 0x1d1   :  { %1161 = vmatprep.subr.mxu0 %v516_v19  ;;  %1232 = vmatprep.subr.mxu1 %v708_v20  ;;  %v1255_v18 = vld [vmem:[#allocation11 + $0x20] sm:$0xff]  ;;  %v1270_v20 = vld [vmem:[#allocation11 + $0x98] sm:$0xff] }
 0x1d2   :  { %1162 = vmatpush2.msra.mxu0 %v515_v21  ;;  %1233 = vmatpush2.msra.mxu1 %v707_v22  ;;  %v1287_v19 = vld [vmem:[#allocation11 + $0x120] sm:$0xff]  ;;  %v1302_v21 = vld [vmem:[#allocation11 + $0x198] sm:$0xff] }
 0x1d3   :  { %1163 = vmatprep.subr.mxu0 %v510_v23  ;;  %1234 = vmatprep.subr.mxu1 %v702_v24  ;;  %v1254_v22 = vld [vmem:[#allocation11 + $0x18] sm:$0xff]  ;;  %v1269_v24 = vld [vmem:[#allocation11 + $0x90] sm:$0xff] }
 0x1d4   :  { %1164 = vmatpush2.msra.mxu0 %v509_v25  ;;  %1235 = vmatpush2.msra.mxu1 %v701_v26  ;;  %v1286_v23 = vld [vmem:[#allocation11 + $0x118] sm:$0xff]  ;;  %v1301_v25 = vld [vmem:[#allocation11 + $0x190] sm:$0xff] }
 0x1d5   :  { %1165 = vmatprep.subr.mxu0 %v504_v27  ;;  %1236 = vmatprep.subr.mxu1 %v696_v28  ;;  %v1253_v26 = vld [vmem:[#allocation11 + $0x10] sm:$0xff]  ;;  %v1268_v28 = vld [vmem:[#allocation11 + $0x88] sm:$0xff] }
 0x1d6   :  { %1166 = vmatpush2.msra.mxu0 %v503_v29  ;;  %1237 = vmatpush2.msra.mxu1 %v695_v30  ;;  %v1285_v27 = vld [vmem:[#allocation11 + $0x110] sm:$0xff]  ;;  %v1300_v29 = vld [vmem:[#allocation11 + $0x188] sm:$0xff] }
 0x1d7   :  { %1168 = vmatmul.mubr.f32.vlgmr.msra.gmra.mxu0 %v1974_v0  ;;  %1239 = vmatmul.mubr.f32.vlgmr.msra.gmra.mxu1 %v1968_v61  ;;  %v1311_v0 = vld [vmem:[#allocation11 + $0x1e0] sm:$0xff]  ;;  %v1252_v30 = vld [vmem:[#allocation11 + $0x8] sm:$0xff] }
 0x1d8   :  { %1590 = vmatprep.subr.mxu0 %v1282_v31  ;;  %1625 = vmatprep.subr.mxu1 %v1314_v32  ;;  %v1263_v61 = vld [vmem:[#allocation11 + $0x60] sm:$0xff]  ;;  %v1284_v31 = vld [vmem:[#allocation11 + $0x108] sm:$0xff] }
 0x1d9   :  { %1591 = vmatpush3.msra.mxu0 %v1266_v62  ;;  %1626 = vmatpush3.msra.mxu1 %v1298_v33  ;;  %v1267_v32 = vld [vmem:[#allocation11 + $0x80] sm:$0xff] }
 0x1da   :  { %1592 = vmatprep.subr.mxu0 %v1281_v63  ;;  %1627 = vmatprep.subr.mxu1 %v1313_v34  ;;  %v1299_v62 = vld [vmem:[#allocation11 + $0x180] sm:$0xff]  ;;  %v1346_v34 = vld [vmem:[#allocation11 + $0x2f8] sm:$0xff] }
 0x1db   :  { %1593 = vmatpush3.msra.mxu0 %v1265_v35  ;;  %1628 = vmatpush3.msra.mxu1 %v1297_v36  ;;  %v1251_v33 = vld [vmem:[#allocation11] sm:$0xff]  ;;  %v1988_v35 = vld [vmem:[#allocation10] sm:$0x3f] }
 0x1dc   :  { %1594 = vmatprep.subr.mxu0 %v1280_v37  ;;  %1629 = vmatprep.subr.mxu1 %v1312_v38  ;;  %v1283_v63 = vld [vmem:[#allocation11 + $0x100] sm:$0xff]  ;;  %v792_v36 = vrot.slane %v1988_v35, %v222_v45  ;;  %v796_v37 = vrot.slane %v1988_v35, %v226_v47  ;;  %v1344_v45 = vld [vmem:[#allocation11 + $0x2e8] sm:$0xff] }
 0x1dd   :  { %1595 = vmatpush3.msra.mxu0 %v1264_v39  ;;  %1630 = vmatpush3.msra.mxu1 %v1296_v40  ;;  %v1343_v47 = vld [vmem:[#allocation11 + $0x2e0] sm:$0xff] }
 0x1de   :  { %1596 = vmatprep.subr.mxu0 %v1279_v41  ;;  %1631 = vmatprep.subr.mxu1 %v1311_v0 }
 0x1df   :  { %1597 = vmatpush3.msra.mxu0 %v1263_v61  ;;  %1632 = vmatpush3.msra.mxu1 %v1295_v42 }
 0x1e0   :  { %1598 = vmatprep.subr.mxu0 %v1278_v46  ;;  %1633 = vmatprep.subr.mxu1 %v1310_v49 }
 0x1e1   :  { %1599 = vmatpush3.msra.mxu0 %v1262_v50  ;;  %1634 = vmatpush3.msra.mxu1 %v1294_v51  ;;  %v1330_v51 = vld [vmem:[#allocation11 + $0x278] sm:$0xff] }
 0x1e2   :  { %1600 = vmatprep.subr.mxu0 %v1277_v52  ;;  %1635 = vmatprep.subr.mxu1 %v1309_v53  ;;  %v1345_v52 = vld [vmem:[#allocation11 + $0x2f0] sm:$0xff] }
 0x1e3   :  { %1601 = vmatpush3.msra.mxu0 %v1261_v54  ;;  %1636 = vmatpush3.msra.mxu1 %v1293_v55  ;;  %v1329_v53 = vld [vmem:[#allocation11 + $0x270] sm:$0xff]  ;;  %v1328_v54 = vld [vmem:[#allocation11 + $0x268] sm:$0xff]  ;;  %v1327_v55 = vld [vmem:[#allocation11 + $0x260] sm:$0xff] }
 0x1e4   :  { %1602 = vmatprep.subr.mxu0 %v1276_v56  ;;  %1637 = vmatprep.subr.mxu1 %v1308_v57  ;;  %v1342_v56 = vld [vmem:[#allocation11 + $0x2d8] sm:$0xff] }
 0x1e5   :  { %1603 = vmatpush3.msra.mxu0 %v1260_v58  ;;  %1638 = vmatpush3.msra.mxu1 %v1292_v59  ;;  %v1326_v57 = vld [vmem:[#allocation11 + $0x258] sm:$0xff]  ;;  %v1341_v58 = vld [vmem:[#allocation11 + $0x2d0] sm:$0xff] }
 0x1e6   :  { %1604 = vmatprep.subr.mxu0 %v1275_v60  ;;  %1639 = vmatprep.subr.mxu1 %v1307_v1  ;;  %v1325_v59 = vld [vmem:[#allocation11 + $0x250] sm:$0xff]  ;;  %v1340_v60 = vld [vmem:[#allocation11 + $0x2c8] sm:$0xff] }
 0x1e7   :  { %1605 = vmatpush3.msra.mxu0 %v1259_v2  ;;  %1640 = vmatpush3.msra.mxu1 %v1291_v3  ;;  %v1324_v1 = vld [vmem:[#allocation11 + $0x248] sm:$0xff]  ;;  %v1339_v2 = vld [vmem:[#allocation11 + $0x2c0] sm:$0xff] }
 0x1e8   :  { %1606 = vmatprep.subr.mxu0 %v1274_v4  ;;  %1641 = vmatprep.subr.mxu1 %v1306_v5  ;;  %v1323_v3 = vld [vmem:[#allocation11 + $0x240] sm:$0xff]  ;;  %v1338_v4 = vld [vmem:[#allocation11 + $0x2b8] sm:$0xff] }
 0x1e9   :  { %1607 = vmatpush3.msra.mxu0 %v1258_v6  ;;  %1642 = vmatpush3.msra.mxu1 %v1290_v7  ;;  %v1322_v5 = vld [vmem:[#allocation11 + $0x238] sm:$0xff]  ;;  %v1337_v6 = vld [vmem:[#allocation11 + $0x2b0] sm:$0xff] }
 0x1ea   :  { %1608 = vmatprep.subr.mxu0 %v1273_v8  ;;  %1643 = vmatprep.subr.mxu1 %v1305_v9  ;;  %v1321_v7 = vld [vmem:[#allocation11 + $0x230] sm:$0xff]  ;;  %v1336_v8 = vld [vmem:[#allocation11 + $0x2a8] sm:$0xff] }
 0x1eb   :  { %1609 = vmatpush3.msra.mxu0 %v1257_v10  ;;  %1644 = vmatpush3.msra.mxu1 %v1289_v11  ;;  %v1320_v9 = vld [vmem:[#allocation11 + $0x228] sm:$0xff]  ;;  %v1335_v10 = vld [vmem:[#allocation11 + $0x2a0] sm:$0xff] }
 0x1ec   :  { %1610 = vmatprep.subr.mxu0 %v1272_v12  ;;  %1645 = vmatprep.subr.mxu1 %v1304_v13  ;;  %v1319_v11 = vld [vmem:[#allocation11 + $0x220] sm:$0xff]  ;;  %v1334_v12 = vld [vmem:[#allocation11 + $0x298] sm:$0xff] }
 0x1ed   :  { %1611 = vmatpush3.msra.mxu0 %v1256_v14  ;;  %1646 = vmatpush3.msra.mxu1 %v1288_v15  ;;  %v1318_v13 = vld [vmem:[#allocation11 + $0x218] sm:$0xff]  ;;  %v1333_v14 = vld [vmem:[#allocation11 + $0x290] sm:$0xff] }
 0x1ee   :  { %1612 = vmatprep.subr.mxu0 %v1271_v16  ;;  %1647 = vmatprep.subr.mxu1 %v1303_v17  ;;  %v1317_v15 = vld [vmem:[#allocation11 + $0x210] sm:$0xff]  ;;  %v1332_v16 = vld [vmem:[#allocation11 + $0x288] sm:$0xff] }
 0x1ef   :  { %1613 = vmatpush3.msra.mxu0 %v1255_v18  ;;  %1648 = vmatpush3.msra.mxu1 %v1287_v19  ;;  %v1316_v17 = vld [vmem:[#allocation11 + $0x208] sm:$0xff]  ;;  %v1331_v18 = vld [vmem:[#allocation11 + $0x280] sm:$0xff] }
 0x1f0   :  { %1614 = vmatprep.subr.mxu0 %v1270_v20  ;;  %1649 = vmatprep.subr.mxu1 %v1302_v21  ;;  %v1315_v19 = vld [vmem:[#allocation11 + $0x200] sm:$0xff]  ;;  %v800_v20 = vrot.slane %v1988_v35, %v230_v44  ;;  %v804_v21 = vrot.slane %v1988_v35, %v234_v48  ;;  %v811_v44 = vsub.s32 5, %v1954_v43 }
 0x1f1   :  { %1615 = vmatpush3.msra.mxu0 %v1254_v22  ;;  %1650 = vmatpush3.msra.mxu1 %v1286_v23 }
 0x1f2   :  { %1616 = vmatprep.subr.mxu0 %v1269_v24  ;;  %1651 = vmatprep.subr.mxu1 %v1301_v25  ;;  %v812_v48 = vrot.slane %v1988_v35, %v811_v44 }
 0x1f3   :  { %1617 = vmatpush3.msra.mxu0 %v1253_v26  ;;  %1652 = vmatpush3.msra.mxu1 %v1285_v27 }
 0x1f4   :  { %1618 = vmatprep.subr.mxu0 %v1268_v28  ;;  %1653 = vmatprep.subr.mxu1 %v1300_v29 }
 0x1f5   :  { %1619 = vmatpush3.msra.mxu0 %v1252_v30  ;;  %1654 = vmatpush3.msra.mxu1 %v1284_v31 }
 0x1f6   :  { %1620 = vmatprep.subr.mxu0 %v1267_v32  ;;  %1655 = vmatprep.subr.mxu1 %v1299_v62  ;;  %v807_v32 = vsub.s32 4, %v1954_v43 }
 0x1f7   :  { %1621 = vmatpush3.msra.mxu0 %v1251_v33  ;;  %1656 = vmatpush3.msra.mxu1 %v1283_v63 }
 0x1f8   :  { %1660 = vmatprep.subr.mxu0 %v1346_v34  ;;  %v808_v62 = vrot.slane %v1988_v35, %v807_v32 }
 0x214   :  { %v885_v38 = vpop.f32.mrf.mxu0  ;;  %v956_v39 = vpop.f32.mrf.mxu1 }
 0x215   :  { %v886_v40 = vadd.f32 %v885_v38, %v792_v36 }
 0x216   :  { %v887_v41 = vpop.f32.mrf.mxu0  ;;  %v958_v42 = vpop.f32.mrf.mxu1 }
 0x217   :  { %v888_v0 = vadd.f32 %v887_v41, %v796_v37  ;;  %v957_v61 = vadd.f32 %v956_v39, %v886_v40 }
 0x219   :  { %v959_v46 = vadd.f32 %v958_v42, %v888_v0  ;;  %v1245_v50 = vmax.f32 %v957_v61, 0.0 }
 0x21b   :  { %v1246_v49 = vmax.f32 %v959_v46, 0.0 }
 0x21d   :  { %1418 = vmatprep.mubr.f32.mxu0 %v1246_v49 }
 0x21e   :  { %1419 = vmatmul.mubr.f32.vlgmr.msra.gmra.mxu0 %v1245_v50  ;;  %v1589_v50 = vld [vmem:[#allocation13] ss:$0 sm:$0xff] }
 0x21f   :  { %1661 = vmatpush3.msra.mxu0 %v1330_v51 }
 0x220   :  { %1662 = vmatprep.subr.mxu0 %v1345_v52 }
 0x221   :  { %1663 = vmatpush3.msra.mxu0 %v1329_v53 }
 0x222   :  { %1664 = vmatprep.subr.mxu0 %v1344_v45 }
 0x223   :  { %1665 = vmatpush3.msra.mxu0 %v1328_v54 }
 0x224   :  { %1666 = vmatprep.subr.mxu0 %v1343_v47 }
 0x225   :  { %1667 = vmatpush3.msra.mxu0 %v1327_v55 }
 0x226   :  { %1668 = vmatprep.subr.mxu0 %v1342_v56 }
 0x227   :  { %1669 = vmatpush3.msra.mxu0 %v1326_v57 }
 0x228   :  { %1670 = vmatprep.subr.mxu0 %v1341_v58 }
 0x229   :  { %1671 = vmatpush3.msra.mxu0 %v1325_v59 }
 0x22a   :  { %1672 = vmatprep.subr.mxu0 %v1340_v60 }
 0x22b   :  { %1673 = vmatpush3.msra.mxu0 %v1324_v1 }
 0x22c   :  { %1674 = vmatprep.subr.mxu0 %v1339_v2 }
 0x22d   :  { %1675 = vmatpush3.msra.mxu0 %v1323_v3 }
 0x22e   :  { %1676 = vmatprep.subr.mxu0 %v1338_v4 }
 0x22f   :  { %1677 = vmatpush3.msra.mxu0 %v1322_v5 }
 0x230   :  { %1678 = vmatprep.subr.mxu0 %v1337_v6 }
 0x231   :  { %1679 = vmatpush3.msra.mxu0 %v1321_v7 }
 0x232   :  { %1680 = vmatprep.subr.mxu0 %v1336_v8 }
 0x233   :  { %1681 = vmatpush3.msra.mxu0 %v1320_v9 }
 0x234   :  { %1682 = vmatprep.subr.mxu0 %v1335_v10 }
 0x235   :  { %1683 = vmatpush3.msra.mxu0 %v1319_v11 }
 0x236   :  { %1684 = vmatprep.subr.mxu0 %v1334_v12 }
 0x237   :  { %1685 = vmatpush3.msra.mxu0 %v1318_v13 }
 0x238   :  { %1686 = vmatprep.subr.mxu0 %v1333_v14 }
 0x239   :  { %1687 = vmatpush3.msra.mxu0 %v1317_v15 }
 0x23a   :  { %1688 = vmatprep.subr.mxu0 %v1332_v16 }
 0x23b   :  { %1689 = vmatpush3.msra.mxu0 %v1316_v17 }
 0x23c   :  { %1690 = vmatprep.subr.mxu0 %v1331_v18 }
 0x23d   :  { %1691 = vmatpush3.msra.mxu0 %v1315_v19 }
 0x255   :  { %v1027_v22 = vpop.f32.mrf.mxu0  ;;  %v1098_v23 = vpop.f32.mrf.mxu1 }
 0x256   :  { %v1028_v24 = vadd.f32 %v1027_v22, %v800_v20 }
 0x257   :  { %v1029_v25 = vpop.f32.mrf.mxu0  ;;  %v1100_v28 = vpop.f32.mrf.mxu1 }
 0x258   :  { %v1030_v26 = vadd.f32 %v1029_v25, %v804_v21  ;;  %v1099_v27 = vadd.f32 %v1098_v23, %v1028_v24 }
 0x25a   :  { %v1101_v29 = vadd.f32 %v1100_v28, %v1030_v26  ;;  %v1247_v31 = vmax.f32 %v1099_v27, 0.0 }
 0x25c   :  { %v1248_v30 = vmax.f32 %v1101_v29, 0.0 }
 0x25e   :  { %1488 = vmatprep.mubr.f32.mxu1 %v1248_v30 }
 0x25f   :  { %1489 = vmatmul.mubr.f32.vlgmr.msra.gmra.mxu1 %v1247_v31 }
 0x297   :  { %v1169_v33 = vpop.f32.mrf.mxu0  ;;  %v1240_v63 = vpop.f32.mrf.mxu1 }
 0x298   :  { %v1170_v34 = vadd.f32 %v1169_v33, %v808_v62 }
 0x299   :  { %v1171_v36 = vpop.f32.mrf.mxu0  ;;  %v1242_v39 = vpop.f32.mrf.mxu1 }
 0x29a   :  { %v1172_v37 = vadd.f32 %v1171_v36, %v812_v48  ;;  %v1241_v38 = vadd.f32 %v1240_v63, %v1170_v34 }
 0x29c   :  { %v1243_v40 = vadd.f32 %v1242_v39, %v1172_v37  ;;  %v1249_v0 = vmax.f32 %v1241_v38, 0.0 }
 0x29e   :  { %v1250_v41 = vmax.f32 %v1243_v40, 0.0 }
 0x2a0   :  { %1558 = vmatprep.mubr.f32.mxu0 %v1250_v41 }
 0x2a1   :  { %1559 = vmatmul.mubr.f32.vlgmr.msra.gmra.mxu0 %v1249_v0 }
 0x2de   :  { %v1622_v61 = vpop.f32.mrf.mxu0 }
 0x2e0   :  { %v1623_v46 = vpop.f32.mrf.mxu0 }
 0x2e1   :  { %v1624_v49 = vadd.f32 %v1623_v46, %v1622_v61 }
 0x2e3   :  { %v1421_v52 = vadd.f32 %v1624_v49, %v1589_v50 }
 0x31f   :  { %v1657_v42 = vpop.f32.mrf.mxu1 }
 0x321   :  { %v1658_v43 = vpop.f32.mrf.mxu1 }
 0x322   :  { %v1659_v51 = vadd.f32 %v1658_v43, %v1657_v42 }
 0x324   :  { %v1491_v45 = vadd.f32 %v1659_v51, %v1421_v52 }
 0x361   :  { %v1692_v35 = vpop.f32.mrf.mxu0 }
 0x363   :  { %v1693_v53 = vpop.f32.mrf.mxu0 }
 0x364   :  { %v1694_v54 = vadd.f32 %v1693_v53, %v1692_v35 }
 0x366   :  { %v1561_v47 = vadd.f32 %v1694_v54, %v1491_v45 }
 0x368   :  { %1564 = vst [vmem:[#allocation14] sm:$0xff] %v1561_v47 }
 0x369   :  { %1860 = shalt.err (!%p1857_p11)
}
 0x36a   :  { %1574 = dma.vmem_to_hbm [thread:$0]  %s1572_s6, 128, %s2016_s7, [#allocation4]  }
 0x36b   :  { %1877 = dma.done.wait [#allocation4], 128  }
 0x36c   :  { %1878 = vsyncadd [#allocation4], 4294967168 }
 0x36d   :  { %1578 = vsyncpa [#allocation3], 1 }
 0x36e   :  { %1579 = vsyncpa [#allocation6], 1 }
 0x36f   :  { %1580 = vsyncpa [#allocation9], 1 }
 0x370   :  { %1581 = vsyncpa [#allocation12], 1 }
 0x371   :  { %1582 = vsyncpa [#allocation4], 1 }

</bundles_post_ra>
